<compile_context>
chip_gen: v7x
topology: tpu7x:2x2x1
jax: 0.10.0
libtpu: 0.0.40
codegen_flags: <defaults>
</compile_context>

<pallas_src>
import functools

import jax
import jax.numpy as jnp
from jax.experimental import pallas as pl
from jax.experimental.pallas import tpu as pltpu


# ------------------------------ Pallas kernel ------------------------------- #

def _fused_deconv_routing_kernel(x_ref, w_ref, b_ref, o_ref, *, routings, eps):
    """One (batch, kernel-offset, spatial-tile) block: votes + dynamic routing.

    x_ref : (Pi, Ci, T)   input capsule poses, spatial tile T on lanes
    w_ref : (Pi, Co, Po)  deconv weights for this (kh, kw) offset
    b_ref : (Co, Po)      routing biases
    o_ref : (Co, Po, T)   routed output capsules for this tile / offset
    """
    x = x_ref[...]
    w = w_ref[...]
    Pi, Ci, T = x.shape
    _, Co, Po = w.shape

    # --- transposed-conv votes: votes[ci,co,po,t] = sum_pi x[pi,ci,t] * w[pi,co,po]
    # Contraction depth is only Pi=8 -> Pi VPU broadcast-FMAs, no MXU.
    votes = x[0][:, None, None, :] * w[0][None, :, :, None]
    for p in range(1, Pi):
        votes = votes + x[p][:, None, None, :] * w[p][None, :, :, None]
    # votes: (Ci, Co, Po, T) float32

    bias_b = b_ref[...][:, :, None]                 # (Co, Po, 1), hoisted out of loop

    bij = jnp.zeros((Ci, Co, T), jnp.float32)       # routing logits, no size-1 Po dim
    vj = jnp.zeros((Co, Po, T), jnp.float32)
    for t in range(routings):                       # static & small -> unrolled
        # softmax over output capsules Co
        m = jnp.max(bij, axis=1, keepdims=True)                      # (Ci, 1, T)
        e = jnp.exp(bij - m)                                         # (Ci, Co, T)
        cij = e * pl.reciprocal(jnp.sum(e, axis=1, keepdims=True), approx=True)
        # aggregate votes over input capsules Ci, add bias
        sj = jnp.sum(cij[:, :, None, :] * votes, axis=0) + bias_b    # (Co, Po, T)
        # squash over pose Po: scale = |s|^2 / ((1 + |s|^2) * |s|)   (EUP ops)
        n2 = jnp.sum(sj * sj, axis=1, keepdims=True)                 # (Co, 1, T)
        scale = n2 * jax.lax.rsqrt(n2 + eps) * pl.reciprocal(1.0 + n2, approx=True)
        vj = scale * sj                                              # (Co, Po, T)
        if t < routings - 1:
            bij = bij + jnp.sum(votes * vj[None, :, :, :], axis=2)   # (Ci, Co, T)
    o_ref[...] = vj


# ------------------------------ Forward pass -------------------------------- #

def _pick_spatial_tile(S, max_lanes=2048):
    """Largest lane-dense tile of the flattened input-spatial axis that divides S."""
    if S <= max_lanes:
        return S                              # block == full dim is always legal
    for cand in range(max_lanes, 127, -128):  # prefer multiples of 128
        if S % cand == 0:
            return cand
    # TODO(synk): pad/mask the spatial axis when S has no multiple-of-128 divisor.
    return S


def deconv_caps_forward(x, weight, biases, Co, Po, K, stride, routings=3):
    """x: [B, Ci, Pi, Hi, Wi] f32; weight: [Pi, Co*Po, K, K]; biases: [1,1,Co,Po,1,1]."""
    B, Ci, Pi, Hi, Wi = x.shape
    # TODO(synk): stride != K needs an overlapping scatter-add col2im path.
    assert stride == K, "this kernel implements the non-overlapping case stride == K"
    Ho, Wo = (Hi - 1) * stride + K, (Wi - 1) * stride + K
    S = Hi * Wi
    KK = K * K

    # Layout plumbing in XLA (all tiny / free reshapes):
    #   x_t : (B, Pi, Ci, S)   -- Pi on a leading axis so the in-kernel Pi-slice
    #                             picks whole vreg groups; spatial on lanes.
    #   w_t : (KK, Pi, Co, Po) -- one kernel-offset slice per grid point.
    x_t = jnp.transpose(x, (0, 2, 1, 3, 4)).reshape(B, Pi, Ci, S).astype(jnp.float32)
    w_t = jnp.transpose(weight.reshape(Pi, Co, Po, KK), (3, 0, 1, 2)).astype(jnp.float32)
    bias2d = biases.reshape(Co, Po).astype(jnp.float32)

    T_s = _pick_spatial_tile(S)
    assert S % T_s == 0
    grid = (B, KK, S // T_s)

    out_perm = pl.pallas_call(
        functools.partial(_fused_deconv_routing_kernel, routings=routings, eps=1e-12),
        out_shape=jax.ShapeDtypeStruct((B, KK, Co, Po, S), jnp.float32),
        grid=grid,
        in_specs=[
            pl.BlockSpec((None, Pi, Ci, T_s), lambda b, kk, s: (b, 0, 0, s)),
            pl.BlockSpec((None, Pi, Co, Po), lambda b, kk, s: (kk, 0, 0, 0)),
            pl.BlockSpec((Co, Po), lambda b, kk, s: (0, 0)),
        ],
        out_specs=pl.BlockSpec((None, None, Co, Po, T_s),
                               lambda b, kk, s: (b, kk, 0, 0, s)),
        compiler_params=pltpu.CompilerParams(
            dimension_semantics=("parallel", "parallel", "parallel"),
            vmem_limit_bytes=32 * 1024 * 1024),
    )(x_t, w_t, bias2d)

    # Pixel-shuffle the kernel-offset axis back into (Ho, Wo).  Pure layout work
    # on the routed output only (Ci-times smaller than the fused-away votes).
    out = out_perm.reshape(B, K, K, Co, Po, Hi, Wi)
    out = jnp.transpose(out, (0, 3, 4, 5, 1, 6, 2)).reshape(B, Co, Po, Ho, Wo)
    return out


# ---------------------------- pure-JAX reference ----------------------------- #

def deconv_caps_ref(x, weight, biases, Co, Po, K, stride, routings=3):
    B, Ci, Pi, Hi, Wi = x.shape
    Ho, Wo = (Hi - 1) * stride + K, (Wi - 1) * stride + K
    cols = jnp.einsum('bcphw,pokl->bchwokl', x, weight)        # [B,Ci,Hi,Wi,Co*Po,K,K]
    cols = cols.reshape(B, Ci, Hi, Wi, Co, Po, K, K)
    votes = jnp.transpose(cols, (0, 1, 4, 5, 2, 6, 3, 7)).reshape(
        B, Ci, Co, Po, Ho, Wo)
    bij = jnp.zeros((B, Ci, Co, 1, Ho, Wo), jnp.float32)
    vj = None
    for t in range(routings):
        cij = jax.nn.softmax(bij, axis=2)
        sj = jnp.sum(cij * votes, axis=1, keepdims=True) + biases
        n2 = jnp.sum(sj * sj, axis=3, keepdims=True)
        n = jnp.sqrt(n2)
        vj = n2 * sj / ((1.0 + n2) * n)
        if t < routings - 1:
            bij = bij + jnp.sum(votes * vj, axis=3, keepdims=True)
    return vj[:, 0]


# ----------------------------------- main ------------------------------------ #

if __name__ == "__main__":
    # Module config (small): Ci=4, Pi=8, Co=4, Po=8, K=stride=2, routings=3
    B, Ci, Pi, Hi, Wi = 2, 4, 8, 8, 8
    Co, Po, K, stride, routings = 4, 8, 2, 2, 3

    key = jax.random.PRNGKey(0)
    kx, kw = jax.random.split(key)
    x = jax.random.normal(kx, (B, Ci, Pi, Hi, Wi), dtype=jnp.float32)
    # nn.ConvTranspose2d(Pi, Co*Po, K, stride, bias=False) -> weight [Pi, Co*Po, K, K]
    weight = 0.1 * jax.random.normal(kw, (Pi, Co * Po, K, K), dtype=jnp.float32)
    # nn.Parameter(torch.zeros(1,1,Co,Po,1,1) + 0.1)
    biases = jnp.full((1, 1, Co, Po, 1, 1), 0.1, dtype=jnp.float32)

    out = deconv_caps_forward(x, weight, biases, Co, Po, K, stride, routings)
    out = jax.block_until_ready(out)

    ref = deconv_caps_ref(x, weight, biases, Co, Po, K, stride, routings)
    assert out.shape == (B, Co, Po, (Hi - 1) * stride + K, (Wi - 1) * stride + K)
    assert jnp.all(jnp.isfinite(out))
    assert jnp.allclose(out, ref, rtol=1e-2, atol=1e-2), \
        f"max abs diff {jnp.max(jnp.abs(out - ref))}"

    print("KERNEL_OK")
</pallas_src>

<mosaic_0001>
module attributes {stable_mosaic.version = 11 : i64} {
  func.func @_fused_deconv_routing_kernel(%arg0: i32, %arg1: i32, %arg2: i32, %arg3: memref<1x8x4x64xf32, #tpu.memory_space<vmem>>, %arg4: memref<1x8x4x8xf32, #tpu.memory_space<vmem>>, %arg5: memref<4x8xf32, #tpu.memory_space<vmem>>, %arg6: memref<1x1x4x8x64xf32, #tpu.memory_space<vmem>>) attributes {dimension_semantics = [#tpu.dimension_semantics<parallel>, #tpu.dimension_semantics<parallel>, #tpu.dimension_semantics<parallel>], iteration_bounds = array<i64: 2, 4, 1>, scalar_prefetch = 0 : i64, scratch_operands = 0 : i64, tpu.core_type = #tpu.core_type<tc>, window_params = [{transform_indices = @transform_0, window_bounds = array<i64: 1, 8, 4, 64>}, {transform_indices = @transform_1, window_bounds = array<i64: 1, 8, 4, 8>}, {pipeline_mode = #tpu.pipeline_mode<synchronous>, transform_indices = @transform_2, window_bounds = array<i64: 4, 8>}, {transform_indices = @transform_3, window_bounds = array<i64: 1, 1, 4, 8, 64>}]} {
    %c0 = arith.constant 0 : index
    %c0_0 = arith.constant 0 : index
    %c0_1 = arith.constant 0 : index
    %c0_2 = arith.constant 0 : index
    %0 = vector.load %arg3[%c0, %c0_0, %c0_1, %c0_2] : memref<1x8x4x64xf32, #tpu.memory_space<vmem>>, vector<1x8x4x64xf32>
    %1 = vector.shape_cast %0 : vector<1x8x4x64xf32> to vector<8x4x64xf32>
    %c0_3 = arith.constant 0 : index
    %c0_4 = arith.constant 0 : index
    %c0_5 = arith.constant 0 : index
    %c0_6 = arith.constant 0 : index
    %2 = vector.load %arg4[%c0_3, %c0_4, %c0_5, %c0_6] : memref<1x8x4x8xf32, #tpu.memory_space<vmem>>, vector<1x8x4x8xf32>
    %3 = vector.shape_cast %2 : vector<1x8x4x8xf32> to vector<8x4x8xf32>
    %4 = vector.extract_strided_slice %1 {offsets = [0, 0, 0], sizes = [1, 4, 64], strides = [1, 1, 1]} : vector<8x4x64xf32> to vector<1x4x64xf32>
    %5 = vector.shape_cast %4 : vector<1x4x64xf32> to vector<4x64xf32>
    %6 = vector.shape_cast %5 : vector<4x64xf32> to vector<4x1x1x64xf32>
    %7 = vector.extract_strided_slice %3 {offsets = [0, 0, 0], sizes = [1, 4, 8], strides = [1, 1, 1]} : vector<8x4x8xf32> to vector<1x4x8xf32>
    %8 = vector.shape_cast %7 : vector<1x4x8xf32> to vector<4x8xf32>
    %9 = vector.shape_cast %8 : vector<4x8xf32> to vector<1x4x8x1xf32>
    %10 = vector.broadcast %6 : vector<4x1x1x64xf32> to vector<4x4x8x64xf32>
    %11 = vector.broadcast %9 : vector<1x4x8x1xf32> to vector<4x4x8x64xf32>
    %12 = arith.mulf %10, %11 : vector<4x4x8x64xf32>
    %13 = vector.extract_strided_slice %1 {offsets = [1, 0, 0], sizes = [1, 4, 64], strides = [1, 1, 1]} : vector<8x4x64xf32> to vector<1x4x64xf32>
    %14 = vector.shape_cast %13 : vector<1x4x64xf32> to vector<4x64xf32>
    %15 = vector.shape_cast %14 : vector<4x64xf32> to vector<4x1x1x64xf32>
    %16 = vector.extract_strided_slice %3 {offsets = [1, 0, 0], sizes = [1, 4, 8], strides = [1, 1, 1]} : vector<8x4x8xf32> to vector<1x4x8xf32>
    %17 = vector.shape_cast %16 : vector<1x4x8xf32> to vector<4x8xf32>
    %18 = vector.shape_cast %17 : vector<4x8xf32> to vector<1x4x8x1xf32>
    %19 = vector.broadcast %15 : vector<4x1x1x64xf32> to vector<4x4x8x64xf32>
    %20 = vector.broadcast %18 : vector<1x4x8x1xf32> to vector<4x4x8x64xf32>
    %21 = arith.mulf %19, %20 : vector<4x4x8x64xf32>
    %22 = arith.addf %12, %21 : vector<4x4x8x64xf32>
    %23 = vector.extract_strided_slice %1 {offsets = [2, 0, 0], sizes = [1, 4, 64], strides = [1, 1, 1]} : vector<8x4x64xf32> to vector<1x4x64xf32>
    %24 = vector.shape_cast %23 : vector<1x4x64xf32> to vector<4x64xf32>
    %25 = vector.shape_cast %24 : vector<4x64xf32> to vector<4x1x1x64xf32>
    %26 = vector.extract_strided_slice %3 {offsets = [2, 0, 0], sizes = [1, 4, 8], strides = [1, 1, 1]} : vector<8x4x8xf32> to vector<1x4x8xf32>
    %27 = vector.shape_cast %26 : vector<1x4x8xf32> to vector<4x8xf32>
    %28 = vector.shape_cast %27 : vector<4x8xf32> to vector<1x4x8x1xf32>
    %29 = vector.broadcast %25 : vector<4x1x1x64xf32> to vector<4x4x8x64xf32>
    %30 = vector.broadcast %28 : vector<1x4x8x1xf32> to vector<4x4x8x64xf32>
    %31 = arith.mulf %29, %30 : vector<4x4x8x64xf32>
    %32 = arith.addf %22, %31 : vector<4x4x8x64xf32>
    %33 = vector.extract_strided_slice %1 {offsets = [3, 0, 0], sizes = [1, 4, 64], strides = [1, 1, 1]} : vector<8x4x64xf32> to vector<1x4x64xf32>
    %34 = vector.shape_cast %33 : vector<1x4x64xf32> to vector<4x64xf32>
    %35 = vector.shape_cast %34 : vector<4x64xf32> to vector<4x1x1x64xf32>
    %36 = vector.extract_strided_slice %3 {offsets = [3, 0, 0], sizes = [1, 4, 8], strides = [1, 1, 1]} : vector<8x4x8xf32> to vector<1x4x8xf32>
    %37 = vector.shape_cast %36 : vector<1x4x8xf32> to vector<4x8xf32>
    %38 = vector.shape_cast %37 : vector<4x8xf32> to vector<1x4x8x1xf32>
    %39 = vector.broadcast %35 : vector<4x1x1x64xf32> to vector<4x4x8x64xf32>
    %40 = vector.broadcast %38 : vector<1x4x8x1xf32> to vector<4x4x8x64xf32>
    %41 = arith.mulf %39, %40 : vector<4x4x8x64xf32>
    %42 = arith.addf %32, %41 : vector<4x4x8x64xf32>
    %43 = vector.extract_strided_slice %1 {offsets = [4, 0, 0], sizes = [1, 4, 64], strides = [1, 1, 1]} : vector<8x4x64xf32> to vector<1x4x64xf32>
    %44 = vector.shape_cast %43 : vector<1x4x64xf32> to vector<4x64xf32>
    %45 = vector.shape_cast %44 : vector<4x64xf32> to vector<4x1x1x64xf32>
    %46 = vector.extract_strided_slice %3 {offsets = [4, 0, 0], sizes = [1, 4, 8], strides = [1, 1, 1]} : vector<8x4x8xf32> to vector<1x4x8xf32>
    %47 = vector.shape_cast %46 : vector<1x4x8xf32> to vector<4x8xf32>
    %48 = vector.shape_cast %47 : vector<4x8xf32> to vector<1x4x8x1xf32>
    %49 = vector.broadcast %45 : vector<4x1x1x64xf32> to vector<4x4x8x64xf32>
    %50 = vector.broadcast %48 : vector<1x4x8x1xf32> to vector<4x4x8x64xf32>
    %51 = arith.mulf %49, %50 : vector<4x4x8x64xf32>
    %52 = arith.addf %42, %51 : vector<4x4x8x64xf32>
    %53 = vector.extract_strided_slice %1 {offsets = [5, 0, 0], sizes = [1, 4, 64], strides = [1, 1, 1]} : vector<8x4x64xf32> to vector<1x4x64xf32>
    %54 = vector.shape_cast %53 : vector<1x4x64xf32> to vector<4x64xf32>
    %55 = vector.shape_cast %54 : vector<4x64xf32> to vector<4x1x1x64xf32>
    %56 = vector.extract_strided_slice %3 {offsets = [5, 0, 0], sizes = [1, 4, 8], strides = [1, 1, 1]} : vector<8x4x8xf32> to vector<1x4x8xf32>
    %57 = vector.shape_cast %56 : vector<1x4x8xf32> to vector<4x8xf32>
    %58 = vector.shape_cast %57 : vector<4x8xf32> to vector<1x4x8x1xf32>
    %59 = vector.broadcast %55 : vector<4x1x1x64xf32> to vector<4x4x8x64xf32>
    %60 = vector.broadcast %58 : vector<1x4x8x1xf32> to vector<4x4x8x64xf32>
    %61 = arith.mulf %59, %60 : vector<4x4x8x64xf32>
    %62 = arith.addf %52, %61 : vector<4x4x8x64xf32>
    %63 = vector.extract_strided_slice %1 {offsets = [6, 0, 0], sizes = [1, 4, 64], strides = [1, 1, 1]} : vector<8x4x64xf32> to vector<1x4x64xf32>
    %64 = vector.shape_cast %63 : vector<1x4x64xf32> to vector<4x64xf32>
    %65 = vector.shape_cast %64 : vector<4x64xf32> to vector<4x1x1x64xf32>
    %66 = vector.extract_strided_slice %3 {offsets = [6, 0, 0], sizes = [1, 4, 8], strides = [1, 1, 1]} : vector<8x4x8xf32> to vector<1x4x8xf32>
    %67 = vector.shape_cast %66 : vector<1x4x8xf32> to vector<4x8xf32>
    %68 = vector.shape_cast %67 : vector<4x8xf32> to vector<1x4x8x1xf32>
    %69 = vector.broadcast %65 : vector<4x1x1x64xf32> to vector<4x4x8x64xf32>
    %70 = vector.broadcast %68 : vector<1x4x8x1xf32> to vector<4x4x8x64xf32>
    %71 = arith.mulf %69, %70 : vector<4x4x8x64xf32>
    %72 = arith.addf %62, %71 : vector<4x4x8x64xf32>
    %73 = vector.extract_strided_slice %1 {offsets = [7, 0, 0], sizes = [1, 4, 64], strides = [1, 1, 1]} : vector<8x4x64xf32> to vector<1x4x64xf32>
    %74 = vector.shape_cast %73 : vector<1x4x64xf32> to vector<4x64xf32>
    %75 = vector.shape_cast %74 : vector<4x64xf32> to vector<4x1x1x64xf32>
    %76 = vector.extract_strided_slice %3 {offsets = [7, 0, 0], sizes = [1, 4, 8], strides = [1, 1, 1]} : vector<8x4x8xf32> to vector<1x4x8xf32>
    %77 = vector.shape_cast %76 : vector<1x4x8xf32> to vector<4x8xf32>
    %78 = vector.shape_cast %77 : vector<4x8xf32> to vector<1x4x8x1xf32>
    %79 = vector.broadcast %75 : vector<4x1x1x64xf32> to vector<4x4x8x64xf32>
    %80 = vector.broadcast %78 : vector<1x4x8x1xf32> to vector<4x4x8x64xf32>
    %81 = arith.mulf %79, %80 : vector<4x4x8x64xf32>
    %82 = arith.addf %72, %81 : vector<4x4x8x64xf32>
    %c0_7 = arith.constant 0 : index
    %c0_8 = arith.constant 0 : index
    %83 = vector.load %arg5[%c0_7, %c0_8] : memref<4x8xf32, #tpu.memory_space<vmem>>, vector<4x8xf32>
    %84 = vector.shape_cast %83 : vector<4x8xf32> to vector<4x8x1xf32>
    %cst = arith.constant 0.000000e+00 : f32
    %85 = vector.broadcast %cst : f32 to vector<4x4x64xf32>
    %cst_9 = arith.constant dense<0xFF800000> : vector<4x64xf32>
    %86 = vector.multi_reduction <maximumf>, %85, %cst_9 [1] : vector<4x4x64xf32> to vector<4x64xf32>
    %87 = vector.shape_cast %86 : vector<4x64xf32> to vector<4x1x64xf32>
    %88 = vector.broadcast %87 : vector<4x1x64xf32> to vector<4x4x64xf32>
    %89 = arith.subf %85, %88 : vector<4x4x64xf32>
    %90 = math.exp %89 : vector<4x4x64xf32>
    %cst_10 = arith.constant dense<0.000000e+00> : vector<4x64xf32>
    %91 = vector.multi_reduction <add>, %90, %cst_10 [1] : vector<4x4x64xf32> to vector<4x64xf32>
    %92 = vector.shape_cast %91 : vector<4x64xf32> to vector<4x1x64xf32>
    %93 = tpu.reciprocal %92 {approx = true} : vector<4x1x64xf32> -> vector<4x1x64xf32>
    %94 = vector.broadcast %93 : vector<4x1x64xf32> to vector<4x4x64xf32>
    %95 = arith.mulf %90, %94 : vector<4x4x64xf32>
    %96 = vector.shape_cast %95 : vector<4x4x64xf32> to vector<4x4x1x64xf32>
    %97 = vector.broadcast %96 : vector<4x4x1x64xf32> to vector<4x4x8x64xf32>
    %98 = arith.mulf %97, %82 : vector<4x4x8x64xf32>
    %cst_11 = arith.constant dense<0.000000e+00> : vector<4x8x64xf32>
    %99 = vector.multi_reduction <add>, %98, %cst_11 [0] : vector<4x4x8x64xf32> to vector<4x8x64xf32>
    %100 = vector.broadcast %84 : vector<4x8x1xf32> to vector<4x8x64xf32>
    %101 = arith.addf %99, %100 : vector<4x8x64xf32>
    %102 = arith.mulf %101, %101 : vector<4x8x64xf32>
    %cst_12 = arith.constant dense<0.000000e+00> : vector<4x64xf32>
    %103 = vector.multi_reduction <add>, %102, %cst_12 [1] : vector<4x8x64xf32> to vector<4x64xf32>
    %104 = vector.shape_cast %103 : vector<4x64xf32> to vector<4x1x64xf32>
    %cst_13 = arith.constant 9.99999996E-13 : f32
    %105 = vector.broadcast %cst_13 : f32 to vector<4x1x64xf32>
    %106 = arith.addf %104, %105 : vector<4x1x64xf32>
    %107 = math.rsqrt %106 : vector<4x1x64xf32>
    %108 = arith.mulf %104, %107 : vector<4x1x64xf32>
    %cst_14 = arith.constant 1.000000e+00 : f32
    %109 = vector.broadcast %cst_14 : f32 to vector<4x1x64xf32>
    %110 = arith.addf %109, %104 : vector<4x1x64xf32>
    %111 = tpu.reciprocal %110 {approx = true} : vector<4x1x64xf32> -> vector<4x1x64xf32>
    %112 = arith.mulf %108, %111 : vector<4x1x64xf32>
    %113 = vector.broadcast %112 : vector<4x1x64xf32> to vector<4x8x64xf32>
    %114 = arith.mulf %113, %101 : vector<4x8x64xf32>
    %115 = vector.shape_cast %114 : vector<4x8x64xf32> to vector<1x4x8x64xf32>
    %116 = vector.broadcast %115 : vector<1x4x8x64xf32> to vector<4x4x8x64xf32>
    %117 = arith.mulf %82, %116 : vector<4x4x8x64xf32>
    %cst_15 = arith.constant dense<0.000000e+00> : vector<4x4x64xf32>
    %118 = vector.multi_reduction <add>, %117, %cst_15 [2] : vector<4x4x8x64xf32> to vector<4x4x64xf32>
    %119 = arith.addf %85, %118 : vector<4x4x64xf32>
    %cst_16 = arith.constant dense<0xFF800000> : vector<4x64xf32>
    %120 = vector.multi_reduction <maximumf>, %119, %cst_16 [1] : vector<4x4x64xf32> to vector<4x64xf32>
    %121 = vector.shape_cast %120 : vector<4x64xf32> to vector<4x1x64xf32>
    %122 = vector.broadcast %121 : vector<4x1x64xf32> to vector<4x4x64xf32>
    %123 = arith.subf %119, %122 : vector<4x4x64xf32>
    %124 = math.exp %123 : vector<4x4x64xf32>
    %cst_17 = arith.constant dense<0.000000e+00> : vector<4x64xf32>
    %125 = vector.multi_reduction <add>, %124, %cst_17 [1] : vector<4x4x64xf32> to vector<4x64xf32>
    %126 = vector.shape_cast %125 : vector<4x64xf32> to vector<4x1x64xf32>
    %127 = tpu.reciprocal %126 {approx = true} : vector<4x1x64xf32> -> vector<4x1x64xf32>
    %128 = vector.broadcast %127 : vector<4x1x64xf32> to vector<4x4x64xf32>
    %129 = arith.mulf %124, %128 : vector<4x4x64xf32>
    %130 = vector.shape_cast %129 : vector<4x4x64xf32> to vector<4x4x1x64xf32>
    %131 = vector.broadcast %130 : vector<4x4x1x64xf32> to vector<4x4x8x64xf32>
    %132 = arith.mulf %131, %82 : vector<4x4x8x64xf32>
    %cst_18 = arith.constant dense<0.000000e+00> : vector<4x8x64xf32>
    %133 = vector.multi_reduction <add>, %132, %cst_18 [0] : vector<4x4x8x64xf32> to vector<4x8x64xf32>
    %134 = vector.broadcast %84 : vector<4x8x1xf32> to vector<4x8x64xf32>
    %135 = arith.addf %133, %134 : vector<4x8x64xf32>
    %136 = arith.mulf %135, %135 : vector<4x8x64xf32>
    %cst_19 = arith.constant dense<0.000000e+00> : vector<4x64xf32>
    %137 = vector.multi_reduction <add>, %136, %cst_19 [1] : vector<4x8x64xf32> to vector<4x64xf32>
    %138 = vector.shape_cast %137 : vector<4x64xf32> to vector<4x1x64xf32>
    %cst_20 = arith.constant 9.99999996E-13 : f32
    %139 = vector.broadcast %cst_20 : f32 to vector<4x1x64xf32>
    %140 = arith.addf %138, %139 : vector<4x1x64xf32>
    %141 = math.rsqrt %140 : vector<4x1x64xf32>
    %142 = arith.mulf %138, %141 : vector<4x1x64xf32>
    %cst_21 = arith.constant 1.000000e+00 : f32
    %143 = vector.broadcast %cst_21 : f32 to vector<4x1x64xf32>
    %144 = arith.addf %143, %138 : vector<4x1x64xf32>
    %145 = tpu.reciprocal %144 {approx = true} : vector<4x1x64xf32> -> vector<4x1x64xf32>
    %146 = arith.mulf %142, %145 : vector<4x1x64xf32>
    %147 = vector.broadcast %146 : vector<4x1x64xf32> to vector<4x8x64xf32>
    %148 = arith.mulf %147, %135 : vector<4x8x64xf32>
    %149 = vector.shape_cast %148 : vector<4x8x64xf32> to vector<1x4x8x64xf32>
    %150 = vector.broadcast %149 : vector<1x4x8x64xf32> to vector<4x4x8x64xf32>
    %151 = arith.mulf %82, %150 : vector<4x4x8x64xf32>
    %cst_22 = arith.constant dense<0.000000e+00> : vector<4x4x64xf32>
    %152 = vector.multi_reduction <add>, %151, %cst_22 [2] : vector<4x4x8x64xf32> to vector<4x4x64xf32>
    %153 = arith.addf %119, %152 : vector<4x4x64xf32>
    %cst_23 = arith.constant dense<0xFF800000> : vector<4x64xf32>
    %154 = vector.multi_reduction <maximumf>, %153, %cst_23 [1] : vector<4x4x64xf32> to vector<4x64xf32>
    %155 = vector.shape_cast %154 : vector<4x64xf32> to vector<4x1x64xf32>
    %156 = vector.broadcast %155 : vector<4x1x64xf32> to vector<4x4x64xf32>
    %157 = arith.subf %153, %156 : vector<4x4x64xf32>
    %158 = math.exp %157 : vector<4x4x64xf32>
    %cst_24 = arith.constant dense<0.000000e+00> : vector<4x64xf32>
    %159 = vector.multi_reduction <add>, %158, %cst_24 [1] : vector<4x4x64xf32> to vector<4x64xf32>
    %160 = vector.shape_cast %159 : vector<4x64xf32> to vector<4x1x64xf32>
    %161 = tpu.reciprocal %160 {approx = true} : vector<4x1x64xf32> -> vector<4x1x64xf32>
    %162 = vector.broadcast %161 : vector<4x1x64xf32> to vector<4x4x64xf32>
    %163 = arith.mulf %158, %162 : vector<4x4x64xf32>
    %164 = vector.shape_cast %163 : vector<4x4x64xf32> to vector<4x4x1x64xf32>
    %165 = vector.broadcast %164 : vector<4x4x1x64xf32> to vector<4x4x8x64xf32>
    %166 = arith.mulf %165, %82 : vector<4x4x8x64xf32>
    %cst_25 = arith.constant dense<0.000000e+00> : vector<4x8x64xf32>
    %167 = vector.multi_reduction <add>, %166, %cst_25 [0] : vector<4x4x8x64xf32> to vector<4x8x64xf32>
    %168 = vector.broadcast %84 : vector<4x8x1xf32> to vector<4x8x64xf32>
    %169 = arith.addf %167, %168 : vector<4x8x64xf32>
    %170 = arith.mulf %169, %169 : vector<4x8x64xf32>
    %cst_26 = arith.constant dense<0.000000e+00> : vector<4x64xf32>
    %171 = vector.multi_reduction <add>, %170, %cst_26 [1] : vector<4x8x64xf32> to vector<4x64xf32>
    %172 = vector.shape_cast %171 : vector<4x64xf32> to vector<4x1x64xf32>
    %cst_27 = arith.constant 9.99999996E-13 : f32
    %173 = vector.broadcast %cst_27 : f32 to vector<4x1x64xf32>
    %174 = arith.addf %172, %173 : vector<4x1x64xf32>
    %175 = math.rsqrt %174 : vector<4x1x64xf32>
    %176 = arith.mulf %172, %175 : vector<4x1x64xf32>
    %cst_28 = arith.constant 1.000000e+00 : f32
    %177 = vector.broadcast %cst_28 : f32 to vector<4x1x64xf32>
    %178 = arith.addf %177, %172 : vector<4x1x64xf32>
    %179 = tpu.reciprocal %178 {approx = true} : vector<4x1x64xf32> -> vector<4x1x64xf32>
    %180 = arith.mulf %176, %179 : vector<4x1x64xf32>
    %181 = vector.broadcast %180 : vector<4x1x64xf32> to vector<4x8x64xf32>
    %182 = arith.mulf %181, %169 : vector<4x8x64xf32>
    %c0_29 = arith.constant 0 : index
    %c0_30 = arith.constant 0 : index
    %c0_31 = arith.constant 0 : index
    %c0_32 = arith.constant 0 : index
    %c0_33 = arith.constant 0 : index
    %183 = vector.load %arg6[%c0_29, %c0_30, %c0_31, %c0_32, %c0_33] : memref<1x1x4x8x64xf32, #tpu.memory_space<vmem>>, vector<1x1x4x8x64xf32>
    %184 = vector.shape_cast %183 : vector<1x1x4x8x64xf32> to vector<4x8x64xf32>
    %185 = vector.shape_cast %182 : vector<4x8x64xf32> to vector<1x1x4x8x64xf32>
    tpu.vector_store %arg6[%c0_29, %c0_30, %c0_31, %c0_32, %c0_33], %185 {strides = array<i32>} : memref<1x1x4x8x64xf32, #tpu.memory_space<vmem>>, vector<1x1x4x8x64xf32>,
    return
  }
  func.func @transform_0(%arg0: i32, %arg1: i32, %arg2: i32) -> (i32, i32, i32, i32) {
    %c0_i32 = arith.constant 0 : i32
    %c0_i32_0 = arith.constant 0 : i32
    %c0_i32_1 = arith.constant 0 : i32
    return %arg0, %c0_i32, %c0_i32_0, %arg2 : i32, i32, i32, i32
  }
  func.func @transform_1(%arg0: i32, %arg1: i32, %arg2: i32) -> (i32, i32, i32, i32) {
    %c0_i32 = arith.constant 0 : i32
    %c0_i32_0 = arith.constant 0 : i32
    %c0_i32_1 = arith.constant 0 : i32
    %c0_i32_2 = arith.constant 0 : i32
    return %arg1, %c0_i32, %c0_i32_0, %c0_i32_1 : i32, i32, i32, i32
  }
  func.func @transform_2(%arg0: i32, %arg1: i32, %arg2: i32) -> (i32, i32) {
    %c0_i32 = arith.constant 0 : i32
    %c0_i32_0 = arith.constant 0 : i32
    %c0_i32_1 = arith.constant 0 : i32
    return %c0_i32, %c0_i32_0 : i32, i32
  }
  func.func @transform_3(%arg0: i32, %arg1: i32, %arg2: i32) -> (i32, i32, i32, i32, i32) {
    %c0_i32 = arith.constant 0 : i32
    %c0_i32_0 = arith.constant 0 : i32
    %c0_i32_1 = arith.constant 0 : i32
    return %arg0, %arg1, %c0_i32, %c0_i32_0, %arg2 : i32, i32, i32, i32, i32
  }
}

</mosaic_0001>

<bundles_post_ra>
// kernel: tpu_custom_call.1
= control target key start
LH: loop header
LB: loop body
LE: loop exit
PB: predicated region body
PF: predicated region fallthrough
CT: control target
= control target key end

     0   :  { %s4241_s0 = inlined_call_operand.hbm [shape: f32[2,8,4,64], index: 0, kind: input, shape index: {}]   ;;  %s4242_s1 = inlined_call_operand.hbm [shape: f32[4,8,4,8], index: 1, kind: input, shape index: {}]   ;;  %s4243_s2 = inlined_call_operand.vmem [shape: f32[4,8], index: 2, kind: input, shape index: {}]   ;;  %s4244_s3 = inlined_call_operand.hbm [shape: f32[2,4,4,8,64], index: 3, kind: output, shape index: {}]  }
   0x1   :  { %4283 = sst [smem:[#allocation34_spill]] %s4241_s0 }
   0x2   :  { %4284 = sst [smem:[#allocation35_spill]] %s4244_s3 }
   0x3   :  { %8 = vsyncpa [#allocation3], 0 }
   0x4   :  { %10 = vsyncpa [#allocation3 + $0x1], 0 }
   0x5   :  { %11 = vsyncpa [#allocation6], 0 }
   0x6   :  { %13 = vsyncpa [#allocation6 + $0x1], 0 }
   0x7   :  { %14 = vsyncpa [#allocation4], 0 }
   0x8   :  { %16 = vsyncpa [#allocation4 + $0x1], 0  ;;  %s2921_s12 = smov 0   ;;  %s2923_s13 = smov 0  }
   0x9   :  { %s2925_s14 = smov 0   ;;  %s2927_s15 = smov 0  }
   0xa   :  { %s2929_s16 = smov 0   ;;  %s2931_s17 = smov 0  }
   0xb   :  { %s2933_s18 = smov 0   ;;  %s2935_s19 = smov 0  }
   0xc   :  { %s2937_s20 = smov 0   ;;  %s2939_s21 = smov 0  }
   0xd   :  { %s2941_s22 = smov 0   ;;  %s2943_s23 = smov 0  }
   0xe   :  { %s2945_s24 = smov 0   ;;  %s2947_s25 = smov 0  }
   0xf LB: > { %4285 = sst [smem:[#allocation11_spill]] %s2882_s23  ;;  %s2383_s26 = sadd.s32 4294967295, %s2890_s25   ;;  %s2890_s25 = sphi %s2947_s25, %s22_s25   ;;  %s2886_s24 = sphi %s2945_s24, %s4366_s24   ;;  %s2882_s23 = sphi %s2943_s23, %s4365_s23   ;;  %s2878_s22 = sphi %s2941_s22, %s4364_s22   ;;  %s2874_s21 = sphi %s2939_s21, %s4363_s21   ;;  %s2870_s20 = sphi %s2937_s20, %s4375_s20   ;;  %s2866_s19 = sphi %s2935_s19, %s4374_s19   ;;  %s2862_s18 = sphi %s2933_s18, %s4373_s18   ;;  %s2858_s17 = sphi %s2931_s17, %s4372_s17   ;;  %s2854_s16 = sphi %s2929_s16, %s4371_s16   ;;  %s2850_s15 = sphi %s2927_s15, %s4370_s15   ;;  %s2846_s14 = sphi %s2925_s14, %s4369_s14   ;;  %s2842_s13 = sphi %s2923_s13, %s4368_s13   ;;  %s2838_s12 = sphi %s2921_s12, %s4367_s12  }
  0x10   : > { %4286 = sst [smem:[#allocation12_spill]] %s2886_s24  ;;  %p57_p0 = scmp.ne.s32.totalorder %s2870_s20, %s2866_s19 }
  0x11   : > { %p4246_p1 = scmp.eq.s32.totalorder %s2890_s25, 0  ;;  %p63_p2 = scmp.ne.s32.totalorder %s2866_s19, %s2862_s18 }
  0x12   : > { %p2998_p3 = scmp.eq.s32.totalorder %s2383_s26, 0  ;;  %p4245_p6 = scmp.lt.s32.totalorder %s2890_s25, 8 }
  0x13   : > { %p59_p4 = por %p4246_p1, %p57_p0  ;;  %s167_s4 = sand.u32 1, %s2870_s20  }
  0x14   : > { %p3006_p5 = por %p2998_p3, %p63_p2  ;;  %s2411_s5 = sshll.u32 %s2886_s24, 9 }
  0x15   : > { %s2387_s6 = sshll.u32 %s167_s4, 5  ;;  %s4289_s0 = sld [smem:[#allocation34_spill]] }
  0x16   : > { %s4288_s30 = scalar_select %p3006_p5, 1, 0 }
  0x17   : > { %s171_s10 = scalar_lea.vmem [#allocation2], %s2387_s6  ;;  %p3020_p7 = pnand %p4245_p6, %p59_p4 }
  0x18   : > { %s179_s11 = sshll.u32 %s171_s10, 4  ;;  %s3026_s28 = scalar_lea.sflag [#allocation3], %s167_s4  ;;  %s3024_s11 = int_to_ptr.vmem [resolvable:$true] %s179_s11 }
  0x19   : > { %p2682_p9 = pneg %p3020_p7 }
  0x1b   : > { %s3016_s9 = scalar_lea.hbm %s4289_s0, %s2411_s5  ;;  %s2685_s8 = scalar_lea.hbm %s4289_s0, 1024 }
  0x1c   : > { %s2680_s7 = scalar_lea.hbm %s3016_s9, 512  ;;  %p2686_p12 = scmp.lt.u32.totalorder %s3016_s9, %s4289_s0 }
  0x1d   : > { %p2681_p8 = scmp.ne.s32.totalorder %s3016_s9, %s2680_s7  ;;  %p2687_p13 = scmp.lt.u32.totalorder %s2685_s8, %s2680_s7 }
  0x1e   : > { %p2689_p2 = scmp.lt.u32.totalorder %s2680_s7, %s3016_s9 }
  0x1f   : > { %p2683_p10 = pnand %p2682_p9, %p2681_p8  ;;  %p2688_p0 = por %p2687_p13, %p2686_p12 }
  0x21   : > { %p2684_p11 = pneg %p2683_p10  ;;  %p2690_p4 = por %p2689_p2, %p2688_p0 }
  0x23   : > { %p2691_p6 = pnand %p2690_p4, %p2684_p11 }
  0x25   : > { %2694 = shalt.err (!%p2691_p6)
}
  0x26   : > { %s2695_s4 = scalar_lea.vmem %s3024_s11, 512  ;;  %s2892_s5 = smov [#allocation2]  }
  0x27   : > { %p2696_p8 = scmp.ne.s32.totalorder %s3024_s11, %s2695_s4  ;;  %s2700_s6 = sshll.u32 %s2892_s5, 4  ;;  %s2701_s6 = int_to_ptr.vmem [resolvable:$false] %s2700_s6 }
  0x28   : > { %s2702_s27 = scalar_lea.vmem %s2701_s6, 1024  ;;  %p2703_p5 = scmp.lt.s32.totalorder %s3024_s11, %s2701_s6 }
  0x29   : > { %p2698_p10 = pnand %p2696_p8, %p2682_p9  ;;  %p2704_p12 = scmp.lt.s32.totalorder %s2702_s27, %s2695_s4 }
  0x2b   : > { %p2699_p1 = pneg %p2698_p10  ;;  %p2705_p13 = por %p2704_p12, %p2703_p5 }
  0x2d   : > { %p2706_p0 = pnand %p2705_p13, %p2699_p1 }
  0x2f   : > { %2709 = shalt.err (!%p2706_p0)
}
  0x30   : > { %s4248_s7 = smov 64   ;;  %s4249_s8 = smov 4  }
  0x31   : > { %2422 = dma.hbm_to_vmem [thread:$0]  (!%p3020_p7), %s3016_s9, 512, %s3024_s11, %s3026_s28, %s4248_s7, %s4248_s7, %s4249_s8  }
  0x32   : > { %p2393_p1 = scmp.ge.s32.totalorder %s2890_s25, 1  ;;  %p208_p5 = scmp.lt.s32.totalorder %s2890_s25, 9 }
  0x33   : > { %p3061_p6 = scmp.eq.s32.totalorder %s2383_s26, 7  ;;  %s2384_s18 = sadd.s32 4294967294, %s2890_s25  }
  0x34   : > { %p3065_p9 = pnand %p2393_p1, %p208_p5  ;;  %s37_s5 = sadd.s32 1, %s2882_s23 }
  0x35   : > { %p39_p7 = scmp.ge.s32.totalorder %s37_s5, 4  ;;  %s76_s28 = sadd.s32 1, %s2858_s17 }
  0x36   : > { %p83_p11 = scmp.ne.s32.totalorder %s2858_s17, %s2854_s16  ;;  %p89_p2 = scmp.ne.s32.totalorder %s2854_s16, %s2850_s15 }
  0x37   : > { %s4377_s5 = smov (%p39_p7, %s37_s5), 0  ;;  %s4294_s26 = sadd.s32 1, %s2886_s24 }
  0x38   : > { %4293 = sst [smem:[#allocation13_spill]] %s4377_s5  ;;  %s4379_s26 = smov (!%p39_p7, %s4294_s26), %s2886_s24 }
  0x39   : > { %s73_s9 = ssub.s32 %s2882_s23, %s4377_s5  ;;  %s127_s11 = sadd.s32 1, %s2846_s14 }
  0x3a   : > { %p43_p4 = scmp.ge.s32.totalorder %s4379_s26, 2  ;;  %p74_p8 = scmp.eq.s32.totalorder %s73_s9, 0 }
  0x3b   : > { %p3086_p10 = por %p89_p2, %p2998_p3  ;;  %p137_p12 = scmp.ne.s32.totalorder %s2846_s14, %s2842_s13 }
  0x3c   : > { %s4381_s26 = smov (%p43_p4, %s4379_s26), 0  ;;  %p143_p1 = scmp.ne.s32.totalorder %s2842_s13, %s2838_s12 }
  0x3d   : > { %s4295_s15 = scalar_select %p3086_p10, 1, 0 }
  0x3e   : > { %4296 = sst [smem:[#allocation14_spill]] %s4381_s26  ;;  %s45_s27 = ssub.s32 %s2886_s24, %s4381_s26 }
  0x3f   : > { %s3095_s6 = scalar_select %p74_p8, %s2858_s17, %s76_s28  }
  0x40   : > { %p3101_p13 = por %p3061_p6, %p137_p12  ;;  %p48_p0 = scmp.eq.s32.totalorder %s45_s27, 0 }
  0x41   : > { %s122_s29 = sor.u32 %s73_s9, %s45_s27  ;;  %s4298_s8 = sadd.s32 1, %s2870_s20 }
  0x42   : > { %s4297_s7 = scalar_select %p3101_p13, 1, 0 }
  0x43   : > { %p125_p3 = scmp.eq.s32.totalorder %s122_s29, 0  ;;  %p144_p5 = scmp.eq.s32.totalorder %s2384_s18, 7 }
  0x44   : > { %s3110_s0 = scalar_select %p48_p0, %s2870_s20, %s4298_s8  }
  0x45   : > { %s3113_s5 = scalar_select %p125_p3, %s2846_s14, %s127_s11  }
  0x46   : > { %s189_s3 = sand.u32 1, %s2858_s17   ;;  %p4299_p7 = scmp.eq.s32.totalorder %s2890_s25, 0 }
  0x47   : > { %s2390_s10 = sshll.u32 %s189_s3, 5  ;;  %p3121_p6 = por %p144_p5, %p143_p1 }
  0x48   : > { %p85_p2 = por %p83_p11, %p4299_p7  ;;  %s2412_s26 = sshll.u32 %s2882_s23, 9 }
  0x49   : > { %s4300_s28 = scalar_select %p3121_p6, 1, 0 }
  0x4a   : > { %s193_s24 = scalar_lea.vmem [#allocation5], %s2390_s10  ;;  %s3129_s8 = scalar_lea.hbm %s4242_s1, %s2412_s26 }
  0x4b   : > { %s200_s9 = sshll.u32 %s193_s24, 4  ;;  %p4301_p11 = scmp.lt.s32.totalorder %s2890_s25, 8  ;;  %s3131_s9 = int_to_ptr.vmem [resolvable:$true] %s200_s9 }
  0x4c   : > { %s3139_s11 = scalar_lea.sflag [#allocation6], %s189_s3  ;;  %s2710_s24 = scalar_lea.hbm %s3129_s8, 512 }
  0x4d   : > { %p3135_p4 = pnand %p4301_p11, %p85_p2  ;;  %p2711_p8 = scmp.ne.s32.totalorder %s3129_s8, %s2710_s24 }
  0x4e   : > { %s2715_s27 = scalar_lea.hbm %s4242_s1, 2048  ;;  %p2716_p1 = scmp.lt.u32.totalorder %s3129_s8, %s4242_s1 }
  0x4f   : > { %p2712_p12 = pneg %p3135_p4  ;;  %p2717_p5 = scmp.lt.u32.totalorder %s2715_s27, %s2710_s24 }
  0x50   : > { %p2719_p2 = scmp.lt.u32.totalorder %s2710_s24, %s3129_s8 }
  0x51   : > { %p2713_p0 = pnand %p2712_p12, %p2711_p8  ;;  %p2718_p7 = por %p2717_p5, %p2716_p1 }
  0x53   : > { %p2714_p3 = pneg %p2713_p0  ;;  %p2720_p11 = por %p2719_p2, %p2718_p7 }
  0x55   : > { %p2721_p6 = pnand %p2720_p11, %p2714_p3 }
  0x57   : > { %2724 = shalt.err (!%p2721_p6)
}
  0x58   : > { %s2725_s3 = scalar_lea.vmem %s3131_s9, 512  ;;  %s2895_s26 = smov [#allocation5]  }
  0x59   : > { %p2726_p8 = scmp.ne.s32.totalorder %s3131_s9, %s2725_s3  ;;  %s2730_s10 = sshll.u32 %s2895_s26, 4  ;;  %s2731_s10 = int_to_ptr.vmem [resolvable:$false] %s2730_s10 }
  0x5a   : > { %s2732_s23 = scalar_lea.vmem %s2731_s10, 1024  ;;  %p2733_p10 = scmp.lt.s32.totalorder %s3131_s9, %s2731_s10 }
  0x5b   : > { %p2728_p0 = pnand %p2726_p8, %p2712_p12  ;;  %p2734_p1 = scmp.lt.s32.totalorder %s2732_s23, %s2725_s3 }
  0x5d   : > { %p2729_p13 = pneg %p2728_p0  ;;  %p2735_p5 = por %p2734_p1, %p2733_p10 }
  0x5f   : > { %p2736_p7 = pnand %p2735_p5, %p2729_p13 }
  0x61   : > { %2739 = shalt.err (!%p2736_p7)
}
  0x62   : > { %s4303_s24 = smov 4   ;;  %s4304_s27 = smov 64  }
  0x63   : > { %2425 = dma.hbm_to_vmem [thread:$0]  (!%p3135_p4), %s3129_s8, 512, %s3131_s9, %s3139_s11, %s4304_s27, %s4304_s27, %s4303_s24  }
  0x64   : > { %212 = sbr.rel (%p3065_p9) target bundleno = 658 (0x292), region = 32 }
  0x6b   : > { %s214_s29 = sand.u32 1, %s2866_s19   ;;  %p4305_p10 = scmp.ne.s32.totalorder %s4288_s30, 0 }
  0x6c   : > { %s2394_s26 = sshll.u32 %s214_s29, 5  ;;  %s215_s3 = scalar_lea.sflag [#allocation3], %s214_s29 }
  0x6d   : > { %s3173_s10 = scalar_lea.vmem [#allocation2], %s2394_s26 }
  0x6e   : > { %2825 = dma.done.wait (%p4305_p10), %s215_s3, 512  }
  0x6f   : > { %2827 = vsyncadd (%p4305_p10), %s215_s3, 4294966784  ;;  %s223_s18 = sand.u32 1, %s2854_s16   ;;  %p4306_p9 = scmp.ne.s32.totalorder %s4295_s15, 0 }
  0x70   : > { %s2395_s23 = sshll.u32 %s223_s18, 5  ;;  %s224_s9 = scalar_lea.sflag [#allocation6], %s223_s18 }
  0x71   : > { %s3180_s8 = scalar_lea.vmem [#allocation5], %s2395_s23 }
  0x72   : > { %2829 = dma.done.wait (%p4306_p9), %s224_s9, 512  }
  0x73   : > { %2831 = vsyncadd (%p4306_p9), %s224_s9, 4294966784  ;;  %v283_v0 = vlaneseq  ;;  %v264_v4 = vld [vmem:[%s3180_s8 + $0x4] sm:$0xf]  ;;  %v263_v5 = vld [vmem:[%s3180_s8] sm:$0xf]  ;;  %vm1124_vm0 = vcmask 1043456  }
  0x74   : > { %v265_v13 = vld [vmem:[%s3180_s8 + $0x8] sm:$0xf]  ;;  %v266_v19 = vld [vmem:[%s3180_s8 + $0xc] sm:$0xf]  ;;  %v267_v24 = vld [vmem:[%s3180_s8 + $0x10] sm:$0xf] }
  0x75   : > { %v3186_v1 = vshrl.u32 %v283_v0, 7  ;;  %v268_v29 = vld [vmem:[%s3180_s8 + $0x14] sm:$0xf]  ;;  %v269_v34 = vld [vmem:[%s3180_s8 + $0x18] sm:$0xf]  ;;  %v2897_v54 = vmov 0.0  }
  0x76   : > { %v270_v39 = vld [vmem:[%s3180_s8 + $0x1c] sm:$0xf]  ;;  %v1095_v46 = vld [vmem:[%s4243_s2] sm:$0xf]  ;;  %v2896_v51 = vmov 1966171168  }
  0x77   : > { %v3189_v2 = vsub.s32 0, %v3186_v1  ;;  %v3192_v3 = vsub.s32 1, %v3186_v1  ;;  %v3201_v10 = vsub.s32 2, %v3186_v1  ;;  %v3209_v16 = vsub.s32 3, %v3186_v1  ;;  %s252_s15 = sand.u32 1, %s2842_s13   ;;  %s2406_s24 = sshll.u32 %s2874_s21, 2 }
  0x78   : > { %v281_v52 = vunpack.c.l.s4 %v2896_v51  ;;  %v1125_v55 = vsel %vm1124_vm0, 1.0, %v2897_v54  ;;  %v2398_v57 = vld.sshfl [vmem:[%s3173_s10 + $0x4] sm:$0x33 pattern:$0x75316420]  ;;  %vm1149_vm1 = vcmask 523264  }
  0x79   : > { %4307 = vst [vmem:[#allocation15_spill] sm:$0xff] %v3189_v2  ;;  %v388_v6 = vrot.slane %v264_v4, %v3189_v2  ;;  %v299_v7 = vrot.slane %v263_v5, %v3189_v2  ;;  %v395_v8 = vrot.slane %v264_v4, %v3192_v3  ;;  %v306_v9 = vrot.slane %v263_v5, %v3192_v3  ;;  %v2397_v58 = vld.sshfl [vmem:[%s3173_s10] sm:$0x33 pattern:$0x75316420]  ;;  %s2396_s11 = sshll.u32 %s252_s15, 5 }
  0x7a   : > { %v402_v11 = vrot.slane %v264_v4, %v3201_v10  ;;  %v313_v12 = vrot.slane %v263_v5, %v3201_v10  ;;  %v500_v14 = vrot.slane %v265_v13, %v3192_v3  ;;  %v493_v15 = vrot.slane %v265_v13, %v3189_v2  ;;  %v2399_v62 = vld.sshfl [vmem:[%s3173_s10 + $0x8] sm:$0x33 pattern:$0x75316420]  ;;  %s2407_s27 = sshll.u32 %s2878_s22, 4  ;;  %s254_s26 = scalar_lea.vmem [#allocation7], %s2396_s11 }
  0x7b   : > { %390 = vbcast.lane.b32.xlu1 %v388_v6, 256  ;;  %301 = vbcast.lane.b32.xlu0 %v299_v7, 256  ;;  %v409_v17 = vrot.slane %v264_v4, %v3209_v16  ;;  %v320_v18 = vrot.slane %v263_v5, %v3209_v16  ;;  %v598_v20 = vrot.slane %v266_v19, %v3189_v2  ;;  %v282_v53 = vunpack.c.0.s8 %v281_v52  ;;  %v2400_v6 = vld.sshfl [vmem:[%s3173_s10 + $0xc] sm:$0x33 pattern:$0x75316420]  ;;  %s2264_s29 = sadd.s32 %s2407_s27, %s2406_s24 }
  0x7c   : > { %v507_v21 = vrot.slane %v265_v13, %v3201_v10  ;;  %v514_v22 = vrot.slane %v265_v13, %v3209_v16  ;;  %v605_v23 = vrot.slane %v266_v19, %v3192_v3  ;;  %v703_v25 = vrot.slane %v267_v24, %v3189_v2  ;;  %s2267_s3 = sshll.u32 %s254_s26, 4  ;;  %s2408_s21 = sshll.u32 %s2264_s29, 7  ;;  %s4153_s3 = int_to_ptr.vmem [resolvable:$true] %s2267_s3 }
  0x7d   : > { %v612_v26 = vrot.slane %v266_v19, %v3201_v10  ;;  %v619_v27 = vrot.slane %v266_v19, %v3209_v16  ;;  %v710_v28 = vrot.slane %v267_v24, %v3192_v3  ;;  %v808_v30 = vrot.slane %v268_v29, %v3189_v2  ;;  %s4358_s18 = sld [smem:[#allocation35_spill]]  ;;  %s4165_s8 = scalar_lea.sflag [#allocation4], %s252_s15 }
  0x7e   : > { %v717_v31 = vrot.slane %v267_v24, %v3201_v10  ;;  %v724_v32 = vrot.slane %v267_v24, %v3209_v16  ;;  %v815_v33 = vrot.slane %v268_v29, %v3192_v3  ;;  %v913_v35 = vrot.slane %v269_v34, %v3189_v2  ;;  %s2740_s30 = scalar_lea.vmem %s4153_s3, 512  ;;  %p4360_p6 = scmp.ne.s32.totalorder %s4297_s7, 0 }
  0x7f   : > { %397 = vbcast.lane.b32.xlu1 %v395_v8, 256  ;;  %308 = vbcast.lane.b32.xlu0 %v306_v9, 256  ;;  %v822_v36 = vrot.slane %v268_v29, %v3201_v10  ;;  %v829_v37 = vrot.slane %v268_v29, %v3209_v16  ;;  %v920_v38 = vrot.slane %v269_v34, %v3192_v3  ;;  %v1126_v59 = vrot.slane %v1125_v55, 4  ;;  %p2741_p13 = scmp.ne.s32.totalorder %s4153_s3, %s2740_s30  ;;  %s2898_s4 = smov [#allocation7]  }
  0x80   : > { %v1018_v40 = vrot.slane %v270_v39, %v3189_v2  ;;  %v927_v41 = vrot.slane %v269_v34, %v3201_v10  ;;  %v934_v42 = vrot.slane %v269_v34, %v3209_v16  ;;  %v1025_v43 = vrot.slane %v270_v39, %v3192_v3  ;;  %v2401_v8 = vld.sshfl [vmem:[%s3173_s10 + $0x10] sm:$0x33 pattern:$0x75316420]  ;;  %s2744_s11 = sshll.u32 %s2898_s4, 4  ;;  %s2745_s11 = int_to_ptr.vmem [resolvable:$false] %s2744_s11 }
  0x81   : > { %v1039_v44 = vrot.slane %v270_v39, %v3209_v16  ;;  %v1032_v45 = vrot.slane %v270_v39, %v3201_v10  ;;  %v1099_v47 = vrot.slane %v1095_v46, %v3189_v2  ;;  %v1106_v48 = vrot.slane %v1095_v46, %v3192_v3  ;;  %p2742_p4 = pnand %p2741_p13, %p4360_p6  ;;  %s2746_s24 = scalar_lea.vmem %s2745_s11, 1024 }
  0x82   : > { %v1120_v49 = vrot.slane %v1095_v46, %v3209_v16  ;;  %v1113_v50 = vrot.slane %v1095_v46, %v3201_v10  ;;  %v285_v56 = vsub.s32 %v282_v53, %v3186_v1  ;;  %v368_v60 = vcombine.high %v2398_v57, %v2398_v57  ;;  %p2747_p3 = scmp.lt.s32.totalorder %s4153_s3, %s2745_s11  ;;  %p2748_p2 = scmp.lt.s32.totalorder %s2746_s24, %s2740_s30 }
  0x83   : > { %404 = vbcast.lane.b32.xlu1 %v402_v11, 256  ;;  %315 = vbcast.lane.b32.xlu0 %v313_v12, 256  ;;  %v279_v63 = vcombine.high %v2397_v58, %v2397_v58  ;;  %v1127_v3 = vadd.f32 %v1126_v59, %v1125_v55  ;;  %v473_v5 = vcombine.high %v2399_v62, %v2399_v62  ;;  %v2402_v11 = vld.sshfl [vmem:[%s3173_s10 + $0x14] sm:$0x33 pattern:$0x75316420]  ;;  %s4359_s9 = smov %s4358_s18  ;;  %s4159_s23 = scalar_lea.hbm %s4358_s18, %s2408_s21 }
  0x84   : > { %v375_v61 = vrot.slane %v2398_v57, %v285_v56  ;;  %v286_v0 = vrot.slane %v2397_v58, %v285_v56  ;;  %v382_v4 = vrot.slane %v368_v60, %v285_v56  ;;  %v480_v10 = vrot.slane %v2399_v62, %v285_v56  ;;  %p2743_p12 = pneg %p2742_p4  ;;  %p2749_p11 = por %p2748_p2, %p2747_p3 }
  0x85   : > { %v293_v9 = vrot.slane %v279_v63, %v285_v56  ;;  %v1128_v13 = vrot.slane %v1127_v3, 2  ;;  %v578_v16 = vcombine.high %v2400_v6, %v2400_v6  ;;  %v690_v29 = vrot.slane %v2401_v8, %v285_v56 }
  0x86   : > { %v383_v7 = vcombine.high %v375_v61, %v375_v61  ;;  %v3255_v1 = vrot.slane %v375_v61, %v3189_v2  ;;  %v294_v12 = vcombine.high %v286_v0, %v286_v0  ;;  %v3259_v19 = vrot.slane %v382_v4, %v3189_v2  ;;  %p2750_p8 = pnand %p2749_p11, %p2743_p12 }
  0x87   : > { %502 = vbcast.lane.b32.xlu1 %v500_v14, 256  ;;  %495 = vbcast.lane.b32.xlu0 %v493_v15, 256  ;;  %v384_v14 = vcombine.high %v382_v4, %v382_v4  ;;  %v487_v15 = vrot.slane %v473_v5, %v285_v56  ;;  %v3268_v24 = vrot.slane %v293_v9, %v3189_v2  ;;  %vm1479_vm2 = vcmask 1041409  }
  0x88   : > { %v592_v34 = vrot.slane %v578_v16, %v285_v56  ;;  %v3302_v59 = vrot.slane %v690_v29, %v3189_v2  ;;  %vm1482_vm3 = vcmask 1042434   ;;  %vm1485_vm4 = vcmask 1043459  }
  0x89   : > { %vm1509_vm5 = vcmask 519168  }
  0x8a   : > { %v3296_v57 = vrot.slane %v592_v34, %v3189_v2 }
  0x8b   : > { %411 = vbcast.lane.b32.xlu1 %v409_v17, 256  ;;  %322 = vbcast.lane.b32.xlu0 %v320_v18, 256  ;;  %v683_v17 = vcombine.high %v2401_v8, %v2401_v8  ;;  %v2403_v18 = vld.sshfl [vmem:[%s3173_s10 + $0x18] sm:$0x33 pattern:$0x75316420] }
  0x8f   : > { %600 = vbcast.lane.b32.xlu1 %v598_v20, 256  ;;  %509 = vbcast.lane.b32.xlu0 %v507_v21, 256  ;;  %v3262_v20 = vrot.slane %v383_v7, %v3189_v2  ;;  %v3265_v21 = vrot.slane %v286_v0, %v3189_v2 }
  0x93   : > { %516 = vbcast.lane.b32.xlu1 %v514_v22, 256  ;;  %607 = vbcast.lane.b32.xlu0 %v605_v23, 256  ;;  %v788_v22 = vcombine.high %v2402_v11, %v2402_v11  ;;  %v295_v23 = vcombine.high %v293_v9, %v293_v9 }
  0x97   : > { %705 = vbcast.lane.b32.xlu1 %v703_v25, 256  ;;  %614 = vbcast.lane.b32.xlu0 %v612_v26, 256  ;;  %v488_v25 = vcombine.high %v480_v10, %v480_v10  ;;  %v585_v26 = vrot.slane %v2400_v6, %v285_v56 }
  0x9b   : > { %621 = vbcast.lane.b32.xlu1 %v619_v27, 256  ;;  %712 = vbcast.lane.b32.xlu0 %v710_v28, 256  ;;  %v2404_v27 = vld.sshfl [vmem:[%s3173_s10 + $0x1c] sm:$0x33 pattern:$0x75316420]  ;;  %v3272_v28 = vrot.slane %v294_v12, %v3189_v2 }
  0x9c   : > { %v998_v39 = vcombine.high %v2404_v27, %v2404_v27  ;;  %v1005_v54 = vrot.slane %v2404_v27, %v285_v56 }
  0x9e   : > { %v1012_v55 = vrot.slane %v998_v39, %v285_v56 }
  0x9f   : > { %810 = vbcast.lane.b32.xlu1 %v808_v30, 256  ;;  %719 = vbcast.lane.b32.xlu0 %v717_v31, 256  ;;  %v893_v30 = vcombine.high %v2403_v18, %v2403_v18  ;;  %v1129_v31 = vadd.f32 %v1128_v13, %v1127_v3 }
  0xa1   : > { %v907_v46 = vrot.slane %v893_v30, %v285_v56 }
  0xa3   : > { %726 = vbcast.lane.b32.xlu1 %v724_v32, 256  ;;  %817 = vbcast.lane.b32.xlu0 %v815_v33, 256  ;;  %v3275_v32 = vrot.slane %v384_v14, %v3189_v2  ;;  %v489_v33 = vcombine.high %v487_v15, %v487_v15  ;;  %v909_v3 = vcombine.high %v907_v46, %v907_v46 }
  0xa7   : > { %915 = vbcast.lane.b32.xlu1 %v913_v35, 256  ;;  %824 = vbcast.lane.b32.xlu0 %v822_v36, 256  ;;  %v697_v35 = vrot.slane %v683_v17, %v285_v56  ;;  %v3278_v36 = vrot.slane %v480_v10, %v3189_v2  ;;  %v1013_v10 = vcombine.high %v1005_v54, %v1005_v54 }
  0xa9   : > { %v699_v51 = vcombine.high %v697_v35, %v697_v35  ;;  %v3305_v60 = vrot.slane %v697_v35, %v3189_v2 }
  0xab   : > { %831 = vbcast.lane.b32.xlu1 %v829_v37, 256  ;;  %922 = vbcast.lane.b32.xlu0 %v920_v38, 256  ;;  %v795_v37 = vrot.slane %v2402_v11, %v285_v56  ;;  %v802_v38 = vrot.slane %v788_v22, %v285_v56  ;;  %v3314_v5 = vrot.slane %v699_v51, %v3189_v2 }
  0xac   : > { %v1014_v11 = vcombine.high %v1012_v55, %v1012_v55  ;;  %v3340_v22 = vrot.slane %v909_v3, %v3189_v2 }
  0xad   : > { %v803_v52 = vcombine.high %v795_v37, %v795_v37  ;;  %v804_v53 = vcombine.high %v802_v38, %v802_v38  ;;  %v3317_v6 = vrot.slane %v795_v37, %v3189_v2  ;;  %v3320_v7 = vrot.slane %v802_v38, %v3189_v2 }
  0xae   : > { %4309 = vst [vmem:[#allocation17_spill] sm:$0xff] %v3340_v22 }
  0xaf   : > { %1020 = vbcast.lane.b32.xlu1 %v1018_v40, 256  ;;  %929 = vbcast.lane.b32.xlu0 %v927_v41, 256  ;;  %v3281_v40 = vrot.slane %v295_v23, %v3189_v2  ;;  %v3284_v41 = vrot.slane %v487_v15, %v3189_v2  ;;  %v3323_v8 = vrot.slane %v803_v52, %v3189_v2 }
  0xb0   : > { %v3326_v9 = vrot.slane %v804_v53, %v3189_v2  ;;  %v3334_v15 = vrot.slane %v907_v46, %v3189_v2  ;;  %v3343_v23 = vrot.slane %v1005_v54, %v3189_v2 }
  0xb2   : > { %4310 = vst [vmem:[#allocation18_spill] sm:$0xff] %v3343_v23 }
  0xb3   : > { %936 = vbcast.lane.b32.xlu1 %v934_v42, 256  ;;  %1027 = vbcast.lane.b32.xlu0 %v1025_v43, 256  ;;  %v3287_v42 = vrot.slane %v488_v25, %v3189_v2  ;;  %v593_v43 = vcombine.high %v585_v26, %v585_v26 }
  0xb5   : > { %v3299_v58 = vrot.slane %v593_v43, %v3189_v2 }
  0xb7   : > { %1041 = vbcast.lane.b32.xlu1 %v1039_v44, 256  ;;  %1034 = vbcast.lane.b32.xlu0 %v1032_v45, 256  ;;  %v698_v44 = vcombine.high %v690_v29, %v690_v29  ;;  %v900_v45 = vrot.slane %v2403_v18, %v285_v56 }
  0xb9   : > { %v3308_v63 = vrot.slane %v698_v44, %v3189_v2  ;;  %v908_v0 = vcombine.high %v900_v45, %v900_v45  ;;  %v3331_v14 = vrot.slane %v900_v45, %v3189_v2 }
  0xbb   : > { %1101 = vbcast.lane.b32.xlu0 %v1099_v47, 256  ;;  %1108 = vbcast.lane.b32.xlu1 %v1106_v48, 256  ;;  %v1130_v47 = vrot.slane %v1129_v31, 1  ;;  %v3290_v48 = vrot.slane %v489_v33, %v3189_v2  ;;  %v3337_v18 = vrot.slane %v908_v0, %v3189_v2  ;;  %v3354_v33 = vrot.slane %v1013_v10, %v3189_v2 }
  0xbd   : > { %v1131_v56 = vadd.f32 %v1130_v47, %v1129_v31  ;;  %4308 = vst [vmem:[#allocation16_spill] sm:$0xff] %v3337_v18  ;;  %v3351_v31 = vrot.slane %v1012_v55, %v3189_v2  ;;  %4312 = vst [vmem:[#allocation20_spill] sm:$0xff] %v3354_v33 }
  0xbf   : > { %1122 = vbcast.lane.b32.xlu1 %v1120_v49, 256  ;;  %1115 = vbcast.lane.b32.xlu0 %v1113_v50, 256  ;;  %v594_v49 = vcombine.high %v592_v34, %v592_v34  ;;  %v3293_v50 = vrot.slane %v585_v26, %v3189_v2  ;;  %2550 = vrcp.f32 %v1131_v56  ;;  %4311 = vst [vmem:[#allocation19_spill] sm:$0xff] %v3351_v31 }
  0xc0   : > { %v3357_v34 = vrot.slane %v1014_v11, %v3189_v2 }
  0xc1   : > { %v3311_v4 = vrot.slane %v594_v49, %v3189_v2 }
  0xc2   : > { %4313 = vst [vmem:[#allocation21_spill] sm:$0xff] %v3357_v34 }
  0xc9   : > { %v3380_v33 = vpop.eup %2550 }
  0xed   : > { %v391_v61 = vpop.permute.xlu1 %390  ;;  %v302_v62 = vpop.permute.xlu0 %301 }
  0xee   : > { %v433_v12 = vmul.f32 %v3255_v1, %v391_v61  ;;  %v344_v13 = vmul.f32 %v3265_v21, %v302_v62  ;;  %v437_v25 = vmul.f32 %v3259_v19, %v391_v61  ;;  %v441_v26 = vmul.f32 %v3262_v20, %v391_v61 }
  0xef   : > { %v348_v27 = vmul.f32 %v3268_v24, %v302_v62  ;;  %v352_v29 = vmul.f32 %v3272_v28, %v302_v62  ;;  %v445_v30 = vmul.f32 %v3275_v32, %v391_v61  ;;  %v356_v35 = vmul.f32 %v3281_v40, %v302_v62 }
  0xf0   : > { %v449_v37 = vadd.f32 %v433_v12, %v344_v13 }
  0xf1   : > { %v398_v16 = vpop.permute.xlu1 %397  ;;  %v309_v17 = vpop.permute.xlu0 %308  ;;  %v453_v51 = vadd.f32 %v437_v25, %v348_v27  ;;  %v457_v52 = vadd.f32 %v441_v26, %v352_v29  ;;  %v461_v12 = vadd.f32 %v445_v30, %v356_v35 }
  0xf2   : > { %v434_v38 = vmul.f32 %v3255_v1, %v398_v16  ;;  %v438_v39 = vmul.f32 %v3259_v19, %v398_v16  ;;  %v442_v43 = vmul.f32 %v3262_v20, %v398_v16  ;;  %v345_v44 = vmul.f32 %v3265_v21, %v309_v17 }
  0xf3   : > { %v349_v45 = vmul.f32 %v3268_v24, %v309_v17  ;;  %v353_v46 = vmul.f32 %v3272_v28, %v309_v17  ;;  %v446_v53 = vmul.f32 %v3275_v32, %v398_v16  ;;  %v357_v54 = vmul.f32 %v3281_v40, %v309_v17 }
  0xf4   : > { %v450_v13 = vadd.f32 %v434_v38, %v345_v44 }
  0xf5   : > { %v405_v47 = vpop.permute.xlu1 %404  ;;  %v316_v49 = vpop.permute.xlu0 %315  ;;  %v454_v16 = vadd.f32 %v438_v39, %v349_v45  ;;  %v458_v17 = vadd.f32 %v442_v43, %v353_v46 }
  0xf6   : > { %v435_v55 = vmul.f32 %v3255_v1, %v405_v47  ;;  %v439_v61 = vmul.f32 %v3259_v19, %v405_v47  ;;  %v346_v62 = vmul.f32 %v3265_v21, %v316_v49  ;;  %v350_v0 = vmul.f32 %v3268_v24, %v316_v49 }
  0xf7   : > { %v443_v3 = vmul.f32 %v3262_v20, %v405_v47  ;;  %v447_v56 = vmul.f32 %v3275_v32, %v405_v47  ;;  %v354_v10 = vmul.f32 %v3272_v28, %v316_v49  ;;  %v358_v11 = vmul.f32 %v3281_v40, %v316_v49 }
  0xf8   : > { %v462_v47 = vadd.f32 %v446_v53, %v357_v54  ;;  %v451_v31 = vadd.f32 %v435_v55, %v346_v62  ;;  %v455_v23 = vadd.f32 %v439_v61, %v350_v0 }
  0xf9   : > { %v503_v25 = vpop.permute.xlu1 %502  ;;  %v496_v26 = vpop.permute.xlu0 %495  ;;  %v459_v35 = vadd.f32 %v443_v3, %v354_v10  ;;  %v463_v38 = vadd.f32 %v447_v56, %v358_v11 }
  0xfa   : > { %v539_v27 = vmul.f32 %v3278_v36, %v503_v25  ;;  %v543_v29 = vmul.f32 %v3284_v41, %v503_v25  ;;  %v547_v2 = vmul.f32 %v3287_v42, %v503_v25  ;;  %v551_v34 = vmul.f32 %v3290_v48, %v503_v25 }
  0xfb   : > { %v538_v30 = vmul.f32 %v3278_v36, %v496_v26  ;;  %v542_v39 = vmul.f32 %v3284_v41, %v496_v26  ;;  %v546_v43 = vmul.f32 %v3287_v42, %v496_v26  ;;  %v550_v49 = vmul.f32 %v3290_v48, %v496_v26 }
  0xfc   : > { %v555_v44 = vadd.f32 %v539_v27, %v450_v13  ;;  %v559_v45 = vadd.f32 %v543_v29, %v454_v16  ;;  %v563_v46 = vadd.f32 %v547_v2, %v458_v17  ;;  %v567_v18 = vadd.f32 %v551_v34, %v462_v47 }
  0xfd   : > { %v412_v22 = vpop.permute.xlu1 %411  ;;  %v323_v25 = vpop.permute.xlu0 %322  ;;  %v554_v61 = vadd.f32 %v538_v30, %v449_v37  ;;  %v558_v56 = vadd.f32 %v542_v39, %v453_v51  ;;  %v562_v2 = vadd.f32 %v546_v43, %v457_v52  ;;  %v566_v34 = vadd.f32 %v550_v49, %v461_v12 }
  0xfe   : > { %v436_v53 = vmul.f32 %v3255_v1, %v412_v22  ;;  %v440_v54 = vmul.f32 %v3259_v19, %v412_v22  ;;  %v444_v55 = vmul.f32 %v3262_v20, %v412_v22  ;;  %v347_v62 = vmul.f32 %v3265_v21, %v323_v25 }
  0xff   : > { %v351_v0 = vmul.f32 %v3268_v24, %v323_v25  ;;  %v355_v3 = vmul.f32 %v3272_v28, %v323_v25  ;;  %v448_v10 = vmul.f32 %v3275_v32, %v412_v22  ;;  %v359_v11 = vmul.f32 %v3281_v40, %v323_v25 }
 0x100   : > { %v452_v13 = vadd.f32 %v436_v53, %v347_v62 }
 0x101   : > { %v456_v1 = vadd.f32 %v440_v54, %v351_v0  ;;  %v460_v16 = vadd.f32 %v444_v55, %v355_v3  ;;  %v601_v19 = vpop.permute.xlu1 %600  ;;  %v510_v17 = vpop.permute.xlu0 %509  ;;  %v464_v51 = vadd.f32 %v448_v10, %v359_v11 }
 0x102   : > { %v643_v20 = vmul.f32 %v3293_v50, %v601_v19  ;;  %v647_v21 = vmul.f32 %v3296_v57, %v601_v19  ;;  %v651_v24 = vmul.f32 %v3299_v58, %v601_v19  ;;  %v655_v28 = vmul.f32 %v3311_v4, %v601_v19 }
 0x103   : > { %v540_v37 = vmul.f32 %v3278_v36, %v510_v17  ;;  %v544_v32 = vmul.f32 %v3284_v41, %v510_v17  ;;  %v548_v40 = vmul.f32 %v3287_v42, %v510_v17  ;;  %v552_v22 = vmul.f32 %v3290_v48, %v510_v17 }
 0x104   : > { %v659_v52 = vadd.f32 %v643_v20, %v554_v61  ;;  %v663_v12 = vadd.f32 %v647_v21, %v558_v56  ;;  %v667_v26 = vadd.f32 %v651_v24, %v562_v2  ;;  %v671_v27 = vadd.f32 %v655_v28, %v566_v34 }
 0x105   : > { %v556_v29 = vadd.f32 %v540_v37, %v451_v31  ;;  %v560_v47 = vadd.f32 %v544_v32, %v455_v23  ;;  %v564_v30 = vadd.f32 %v548_v40, %v459_v35  ;;  %v517_v39 = vpop.permute.xlu1 %516  ;;  %v608_v43 = vpop.permute.xlu0 %607  ;;  %v568_v55 = vadd.f32 %v552_v22, %v463_v38 }
 0x106   : > { %v541_v49 = vmul.f32 %v3278_v36, %v517_v39  ;;  %v545_v25 = vmul.f32 %v3284_v41, %v517_v39  ;;  %v549_v53 = vmul.f32 %v3287_v42, %v517_v39  ;;  %v553_v54 = vmul.f32 %v3290_v48, %v517_v39 }
 0x107   : > { %v644_v62 = vmul.f32 %v3293_v50, %v608_v43  ;;  %v648_v61 = vmul.f32 %v3296_v57, %v608_v43  ;;  %v652_v0 = vmul.f32 %v3299_v58, %v608_v43  ;;  %v656_v3 = vmul.f32 %v3311_v4, %v608_v43 }
 0x108   : > { %v557_v31 = vadd.f32 %v541_v49, %v452_v13  ;;  %v561_v23 = vadd.f32 %v545_v25, %v456_v1  ;;  %v565_v35 = vadd.f32 %v549_v53, %v460_v16  ;;  %v569_v56 = vadd.f32 %v553_v54, %v464_v51 }
 0x109   : > { %v660_v36 = vadd.f32 %v644_v62, %v555_v44  ;;  %v664_v2 = vadd.f32 %v648_v61, %v559_v45  ;;  %v668_v41 = vadd.f32 %v652_v0, %v563_v46  ;;  %v706_v10 = vpop.permute.xlu1 %705  ;;  %v615_v42 = vpop.permute.xlu0 %614  ;;  %v672_v45 = vadd.f32 %v656_v3, %v567_v18 }
 0x10a   : > { %v748_v48 = vmul.f32 %v3302_v59, %v706_v10  ;;  %v752_v38 = vmul.f32 %v3305_v60, %v706_v10  ;;  %v756_v11 = vmul.f32 %v3308_v63, %v706_v10  ;;  %v760_v34 = vmul.f32 %v3314_v5, %v706_v10 }
 0x10b   : > { %v645_v13 = vmul.f32 %v3293_v50, %v615_v42  ;;  %v649_v1 = vmul.f32 %v3296_v57, %v615_v42  ;;  %v653_v16 = vmul.f32 %v3299_v58, %v615_v42  ;;  %v657_v44 = vmul.f32 %v3311_v4, %v615_v42 }
 0x10c   : > { %v764_v46 = vadd.f32 %v748_v48, %v659_v52  ;;  %v768_v19 = vadd.f32 %v752_v38, %v663_v12  ;;  %v772_v17 = vadd.f32 %v756_v11, %v667_v26  ;;  %v776_v20 = vadd.f32 %v760_v34, %v671_v27 }
 0x10d   : > { %v661_v21 = vadd.f32 %v645_v13, %v556_v29  ;;  %v665_v24 = vadd.f32 %v649_v1, %v560_v47  ;;  %v669_v28 = vadd.f32 %v653_v16, %v564_v30  ;;  %v622_v37 = vpop.permute.xlu1 %621  ;;  %v713_v32 = vpop.permute.xlu0 %712  ;;  %v673_v43 = vadd.f32 %v657_v44, %v568_v55 }
 0x10e   : > { %v646_v40 = vmul.f32 %v3293_v50, %v622_v37  ;;  %v650_v22 = vmul.f32 %v3296_v57, %v622_v37  ;;  %v654_v51 = vmul.f32 %v3299_v58, %v622_v37  ;;  %v658_v39 = vmul.f32 %v3311_v4, %v622_v37 }
 0x10f   : > { %v749_v18 = vmul.f32 %v3302_v59, %v713_v32  ;;  %v753_v52 = vmul.f32 %v3305_v60, %v713_v32  ;;  %v757_v12 = vmul.f32 %v3308_v63, %v713_v32  ;;  %v761_v47 = vmul.f32 %v3314_v5, %v713_v32  ;;  %v4314_v32 = vld [vmem:[#allocation16_spill] sm:$0xff] }
 0x110   : > { %v662_v26 = vadd.f32 %v646_v40, %v557_v31  ;;  %v666_v27 = vadd.f32 %v650_v22, %v561_v23  ;;  %v670_v29 = vadd.f32 %v654_v51, %v565_v35  ;;  %v674_v30 = vadd.f32 %v658_v39, %v569_v56  ;;  %v4315_v22 = vld [vmem:[#allocation17_spill] sm:$0xff] }
 0x111   : > { %v765_v50 = vadd.f32 %v749_v18, %v660_v36  ;;  %v769_v49 = vadd.f32 %v753_v52, %v664_v2  ;;  %v773_v57 = vadd.f32 %v757_v12, %v668_v41  ;;  %v811_v25 = vpop.permute.xlu1 %810  ;;  %v720_v58 = vpop.permute.xlu0 %719  ;;  %v777_v23 = vadd.f32 %v761_v47, %v672_v45 }
 0x112   : > { %v853_v4 = vmul.f32 %v3317_v6, %v811_v25  ;;  %v857_v53 = vmul.f32 %v3320_v7, %v811_v25  ;;  %v861_v54 = vmul.f32 %v3323_v8, %v811_v25  ;;  %v865_v55 = vmul.f32 %v3326_v9, %v811_v25 }
 0x113   : > { %v750_v62 = vmul.f32 %v3302_v59, %v720_v58  ;;  %v754_v61 = vmul.f32 %v3305_v60, %v720_v58  ;;  %v758_v0 = vmul.f32 %v3308_v63, %v720_v58  ;;  %v762_v31 = vmul.f32 %v3314_v5, %v720_v58 }
 0x114   : > { %v869_v35 = vadd.f32 %v853_v4, %v764_v46  ;;  %v873_v3 = vadd.f32 %v857_v53, %v768_v19  ;;  %v877_v56 = vadd.f32 %v861_v54, %v772_v17  ;;  %v881_v36 = vadd.f32 %v865_v55, %v776_v20 }
 0x115   : > { %v766_v2 = vadd.f32 %v750_v62, %v661_v21  ;;  %v770_v41 = vadd.f32 %v754_v61, %v665_v24  ;;  %v774_v10 = vadd.f32 %v758_v0, %v669_v28  ;;  %v727_v42 = vpop.permute.xlu1 %726  ;;  %v818_v48 = vpop.permute.xlu0 %817  ;;  %v778_v1 = vadd.f32 %v762_v31, %v673_v43 }
 0x116   : > { %v751_v38 = vmul.f32 %v3302_v59, %v727_v42  ;;  %v755_v11 = vmul.f32 %v3305_v60, %v727_v42  ;;  %v759_v34 = vmul.f32 %v3308_v63, %v727_v42  ;;  %v763_v13 = vmul.f32 %v3314_v5, %v727_v42 }
 0x117   : > { %v854_v16 = vmul.f32 %v3317_v6, %v818_v48  ;;  %v858_v44 = vmul.f32 %v3320_v7, %v818_v48  ;;  %v862_v45 = vmul.f32 %v3323_v8, %v818_v48  ;;  %v866_v20 = vmul.f32 %v3326_v9, %v818_v48  ;;  %v4318_v48 = vld [vmem:[#allocation20_spill] sm:$0xff] }
 0x118   : > { %v767_v46 = vadd.f32 %v751_v38, %v662_v26  ;;  %v771_v19 = vadd.f32 %v755_v11, %v666_v27  ;;  %v775_v17 = vadd.f32 %v759_v34, %v670_v29  ;;  %v779_v21 = vadd.f32 %v763_v13, %v674_v30  ;;  %v4319_v11 = vld [vmem:[#allocation21_spill] sm:$0xff] }
 0x119   : > { %v870_v59 = vadd.f32 %v854_v16, %v765_v50  ;;  %v874_v24 = vadd.f32 %v858_v44, %v769_v49  ;;  %v878_v60 = vadd.f32 %v862_v45, %v773_v57  ;;  %v916_v28 = vpop.permute.xlu1 %915  ;;  %v825_v63 = vpop.permute.xlu0 %824  ;;  %v882_v12 = vadd.f32 %v866_v20, %v777_v23 }
 0x11a   : > { %v958_v5 = vmul.f32 %v3331_v14, %v916_v28  ;;  %v962_v37 = vmul.f32 %v3334_v15, %v916_v28  ;;  %v966_v40 = vmul.f32 %v4314_v32, %v916_v28  ;;  %v970_v51 = vmul.f32 %v4315_v22, %v916_v28 }
 0x11b   : > { %v855_v39 = vmul.f32 %v3317_v6, %v825_v63  ;;  %v859_v43 = vmul.f32 %v3320_v7, %v825_v63  ;;  %v863_v18 = vmul.f32 %v3323_v8, %v825_v63  ;;  %v867_v52 = vmul.f32 %v3326_v9, %v825_v63 }
 0x11c   : > { %v974_v26 = vadd.f32 %v958_v5, %v869_v35  ;;  %v978_v27 = vadd.f32 %v962_v37, %v873_v3  ;;  %v982_v29 = vadd.f32 %v966_v40, %v877_v56  ;;  %v986_v47 = vadd.f32 %v970_v51, %v881_v36 }
 0x11d   : > { %v871_v30 = vadd.f32 %v855_v39, %v766_v2  ;;  %v875_v50 = vadd.f32 %v859_v43, %v770_v41  ;;  %v879_v49 = vadd.f32 %v863_v18, %v774_v10  ;;  %v832_v57 = vpop.permute.xlu1 %831  ;;  %v923_v25 = vpop.permute.xlu0 %922  ;;  %v883_v55 = vadd.f32 %v867_v52, %v778_v1  ;;  %v4316_v41 = vld [vmem:[#allocation18_spill] sm:$0xff]  ;;  %v4317_v10 = vld [vmem:[#allocation19_spill] sm:$0xff] }
 0x11e   : > { %v856_v58 = vmul.f32 %v3317_v6, %v832_v57  ;;  %v860_v4 = vmul.f32 %v3320_v7, %v832_v57  ;;  %v864_v53 = vmul.f32 %v3323_v8, %v832_v57  ;;  %v868_v54 = vmul.f32 %v3326_v9, %v832_v57 }
 0x11f   : > { %v959_v62 = vmul.f32 %v3331_v14, %v923_v25  ;;  %v963_v61 = vmul.f32 %v3334_v15, %v923_v25  ;;  %v967_v0 = vmul.f32 %v4314_v32, %v923_v25  ;;  %v971_v3 = vmul.f32 %v4315_v22, %v923_v25 }
 0x120   : > { %v872_v31 = vadd.f32 %v856_v58, %v767_v46  ;;  %v876_v23 = vadd.f32 %v860_v4, %v771_v19  ;;  %v880_v35 = vadd.f32 %v864_v53, %v775_v17  ;;  %v884_v56 = vadd.f32 %v868_v54, %v779_v21 }
 0x121   : > { %v975_v6 = vadd.f32 %v959_v62, %v870_v59  ;;  %v979_v36 = vadd.f32 %v963_v61, %v874_v24  ;;  %v983_v7 = vadd.f32 %v967_v0, %v878_v60  ;;  %v1021_v2 = vpop.permute.xlu1 %1020  ;;  %v930_v8 = vpop.permute.xlu0 %929  ;;  %v987_v45 = vadd.f32 %v971_v3, %v882_v12 }
 0x122   : > { %v1063_v9 = vmul.f32 %v4316_v41, %v1021_v2  ;;  %v1067_v42 = vmul.f32 %v4317_v10, %v1021_v2  ;;  %v1071_v38 = vmul.f32 %v4318_v48, %v1021_v2  ;;  %v1075_v34 = vmul.f32 %v4319_v11, %v1021_v2 }
 0x123   : > { %v960_v13 = vmul.f32 %v3331_v14, %v930_v8  ;;  %v964_v1 = vmul.f32 %v3334_v15, %v930_v8  ;;  %v968_v16 = vmul.f32 %v4314_v32, %v930_v8  ;;  %v972_v44 = vmul.f32 %v4315_v22, %v930_v8 }
 0x124   : > { %v3466_v46 = vadd.f32 %v1063_v9, %v974_v26  ;;  %v3468_v19 = vadd.f32 %v1067_v42, %v978_v27  ;;  %v3470_v17 = vadd.f32 %v1071_v38, %v982_v29  ;;  %v3472_v20 = vadd.f32 %v1075_v34, %v986_v47 }
 0x125   : > { %v976_v21 = vadd.f32 %v960_v13, %v871_v30  ;;  %v980_v59 = vadd.f32 %v964_v1, %v875_v50  ;;  %v984_v24 = vadd.f32 %v968_v16, %v879_v49  ;;  %v937_v60 = vpop.permute.xlu1 %936  ;;  %v1028_v28 = vpop.permute.xlu0 %1027  ;;  %v988_v51 = vadd.f32 %v972_v44, %v883_v55 }
 0x126   : > { %v961_v63 = vmul.f32 %v3331_v14, %v937_v60  ;;  %v965_v5 = vmul.f32 %v3334_v15, %v937_v60  ;;  %v969_v37 = vmul.f32 %v4314_v32, %v937_v60  ;;  %v973_v40 = vmul.f32 %v4315_v22, %v937_v60 }
 0x127   : > { %v1064_v39 = vmul.f32 %v4316_v41, %v1028_v28  ;;  %v1068_v43 = vmul.f32 %v4317_v10, %v1028_v28  ;;  %v1072_v18 = vmul.f32 %v4318_v48, %v1028_v28  ;;  %v1076_v27 = vmul.f32 %v4319_v11, %v1028_v28 }
 0x128   : > { %v977_v52 = vadd.f32 %v961_v63, %v872_v31  ;;  %v981_v12 = vadd.f32 %v965_v5, %v876_v23  ;;  %v985_v26 = vadd.f32 %v969_v37, %v880_v35  ;;  %v989_v29 = vadd.f32 %v973_v40, %v884_v56 }
 0x129   : > { %v3482_v14 = vadd.f32 %v1064_v39, %v975_v6  ;;  %v3484_v15 = vadd.f32 %v1068_v43, %v979_v36  ;;  %v3486_v32 = vadd.f32 %v1072_v18, %v983_v7  ;;  %v1042_v22 = vpop.permute.xlu1 %1041  ;;  %v1035_v47 = vpop.permute.xlu0 %1034  ;;  %v3496_v54 = vadd.f32 %v1076_v27, %v987_v45 }
 0x12a   : > { %v1066_v30 = vmul.f32 %v4316_v41, %v1042_v22  ;;  %v1070_v50 = vmul.f32 %v4317_v10, %v1042_v22  ;;  %v1074_v49 = vmul.f32 %v4318_v48, %v1042_v22  ;;  %v1078_v57 = vmul.f32 %v4319_v11, %v1042_v22 }
 0x12b   : > { %v1065_v25 = vmul.f32 %v4316_v41, %v1035_v47  ;;  %v1069_v58 = vmul.f32 %v4317_v10, %v1035_v47  ;;  %v1073_v4 = vmul.f32 %v4318_v48, %v1035_v47  ;;  %v1077_v53 = vmul.f32 %v4319_v11, %v1035_v47 }
 0x12c   : > { %v3498_v55 = vadd.f32 %v1066_v30, %v977_v52  ;;  %v3500_v62 = vadd.f32 %v1070_v50, %v981_v12  ;;  %v3502_v61 = vadd.f32 %v1074_v49, %v985_v26  ;;  %v3504_v0 = vadd.f32 %v1078_v57, %v989_v29 }
 0x12d   : > { %v3506_v31 = vadd.f32 %v1065_v25, %v976_v21  ;;  %v3508_v23 = vadd.f32 %v1069_v58, %v980_v59  ;;  %v3510_v35 = vadd.f32 %v1073_v4, %v984_v24  ;;  %v1133_v3 = vmul.f32 %v3380_v33, %v3466_v46  ;;  %v3536_v1 = vpop.permute.xlu1 %1108  ;;  %v3549_v63 = vpop.permute.xlu0 %1101 }
 0x12e   : > { %4320 = vst [vmem:[#allocation16_spill] sm:$0xff] %v3504_v0  ;;  %v1137_v56 = vmul.f32 %v3380_v33, %v3468_v19  ;;  %v1141_v6 = vmul.f32 %v3380_v33, %v3470_v17  ;;  %v1145_v36 = vmul.f32 %v3380_v33, %v3472_v20  ;;  %v3520_v7 = vadd.f32 %v1077_v53, %v988_v51 }
 0x12f   : > { %v1134_v2 = vmul.f32 %v3380_v33, %v3482_v14  ;;  %v1138_v8 = vmul.f32 %v3380_v33, %v3484_v15  ;;  %v1142_v41 = vmul.f32 %v3380_v33, %v3486_v32  ;;  %v1150_v9 = vsel %vm1149_vm1, %v1133_v3, 0.0  ;;  %4322 = vst [vmem:[#allocation18_spill] sm:$0xff] %v3536_v1  ;;  %4323 = vst [vmem:[#allocation19_spill] sm:$0xff] %v3549_v63 }
 0x130   : > { %4321 = vst [vmem:[#allocation17_spill] sm:$0xff] %v3520_v7  ;;  %v1151_v10 = vsel %vm1149_vm1, %v1137_v56, 0.0  ;;  %v1153_v42 = vsel %vm1149_vm1, %v1141_v6, 0.0  ;;  %v1146_v48 = vmul.f32 %v3380_v33, %v3496_v54  ;;  %v1155_v11 = vsel %vm1149_vm1, %v1145_v36, 0.0 }
 0x131   : > { %v1152_v38 = vadd.f32 %v1151_v10, %v1150_v9  ;;  %v1157_v34 = vsel %vm1149_vm1, %v1134_v2, 0.0  ;;  %v1158_v13 = vsel %vm1149_vm1, %v1138_v8, 0.0  ;;  %v1160_v44 = vsel %vm1149_vm1, %v1142_v41, 0.0  ;;  %v3569_v49 = vpop.permute.xlu1 %1122  ;;  %v3581_v36 = vpop.permute.xlu0 %1115 }
 0x132   : > { %v1159_v16 = vadd.f32 %v1158_v13, %v1157_v34  ;;  %v1136_v45 = vmul.f32 %v3380_v33, %v3498_v55  ;;  %v1140_v21 = vmul.f32 %v3380_v33, %v3500_v62  ;;  %v1144_v24 = vmul.f32 %v3380_v33, %v3502_v61  ;;  %4324 = vst [vmem:[#allocation20_spill] sm:$0xff] %v3569_v49 }
 0x133   : > { %v1154_v59 = vadd.f32 %v1153_v42, %v1152_v38  ;;  %v1148_v60 = vmul.f32 %v3380_v33, %v3504_v0  ;;  %v1135_v28 = vmul.f32 %v3380_v33, %v3506_v31  ;;  %v1139_v51 = vmul.f32 %v3380_v33, %v3508_v23  ;;  %4325 = vst [vmem:[#allocation21_spill] sm:$0xff] %v3581_v36 }
 0x134   : > { %v1161_v5 = vadd.f32 %v1160_v44, %v1159_v16  ;;  %v1171_v37 = vsel %vm1149_vm1, %v1136_v45, 0.0  ;;  %v1172_v40 = vsel %vm1149_vm1, %v1140_v21, 0.0  ;;  %v1162_v43 = vsel %vm1149_vm1, %v1146_v48, 0.0 }
 0x135   : > { %v1156_v39 = vadd.f32 %v1155_v11, %v1154_v59  ;;  %v1173_v18 = vadd.f32 %v1172_v40, %v1171_v37  ;;  %v1174_v12 = vsel %vm1149_vm1, %v1144_v24, 0.0  ;;  %v1143_v26 = vmul.f32 %v3380_v33, %v3510_v35 }
 0x136   : > { %v1163_v52 = vadd.f32 %v1162_v43, %v1161_v5  ;;  %v1164_v27 = vsel %vm1149_vm1, %v1135_v28, 0.0  ;;  %v1147_v47 = vmul.f32 %v3380_v33, %v3520_v7  ;;  %v1165_v30 = vsel %vm1149_vm1, %v1139_v51, 0.0 }
 0x137   : > { %v3561_v29 = vadd.f32 %v1156_v39, %v3549_v63  ;;  %v1175_v22 = vadd.f32 %v1174_v12, %v1173_v18  ;;  %v1176_v57 = vsel %vm1149_vm1, %v1148_v60, 0.0  ;;  %v1166_v25 = vadd.f32 %v1165_v30, %v1164_v27 }
 0x138   : > { %v3567_v50 = vadd.f32 %v1163_v52, %v3536_v1  ;;  %v1167_v53 = vsel %vm1149_vm1, %v1143_v26, 0.0  ;;  %v1169_v2 = vsel %vm1149_vm1, %v1147_v47, 0.0 }
 0x139   : > { %v1182_v58 = vmul.f32 %v3561_v29, %v3561_v29  ;;  %v1177_v4 = vadd.f32 %v1176_v57, %v1175_v22  ;;  %v1168_v33 = vadd.f32 %v1167_v53, %v1166_v25 }
 0x13a   : > { %v1183_v3 = vmul.f32 %v3567_v50, %v3567_v50 }
 0x13b   : > { %v1186_v56 = vsel %vm1149_vm1, %v1182_v58, 0.0  ;;  %v3579_v6 = vadd.f32 %v1177_v4, %v3569_v49  ;;  %v1170_v9 = vadd.f32 %v1169_v2, %v1168_v33 }
 0x13c   : > { %v1187_v8 = vrot.slane %v1186_v56, 4  ;;  %v1193_v41 = vsel %vm1149_vm1, %v1183_v3, 0.0 }
 0x13d   : > { %v1194_v10 = vrot.slane %v1193_v41, 4  ;;  %v1185_v42 = vmul.f32 %v3579_v6, %v3579_v6  ;;  %v3588_v38 = vadd.f32 %v1170_v9, %v3581_v36 }
 0x13e   : > { %v1188_v48 = vadd.f32 %v1187_v8, %v1186_v56 }
 0x13f   : > { %v1195_v11 = vadd.f32 %v1194_v10, %v1193_v41  ;;  %v1207_v34 = vsel %vm1149_vm1, %v1185_v42, 0.0  ;;  %v1184_v44 = vmul.f32 %v3588_v38, %v3588_v38 }
 0x140   : > { %v1189_v13 = vrot.slane %v1188_v48, 2  ;;  %v1208_v16 = vrot.slane %v1207_v34, 4 }
 0x141   : > { %v1196_v45 = vrot.slane %v1195_v11, 2  ;;  %v1200_v24 = vsel %vm1149_vm1, %v1184_v44, 0.0 }
 0x142   : > { %v1190_v21 = vadd.f32 %v1189_v13, %v1188_v48  ;;  %v1209_v59 = vadd.f32 %v1208_v16, %v1207_v34  ;;  %v1201_v28 = vrot.slane %v1200_v24, 4 }
 0x143   : > { %v1197_v60 = vadd.f32 %v1196_v45, %v1195_v11 }
 0x144   : > { %v1191_v5 = vrot.slane %v1190_v21, 1  ;;  %v1210_v37 = vrot.slane %v1209_v59, 2  ;;  %v1202_v39 = vadd.f32 %v1201_v28, %v1200_v24 }
 0x145   : > { %v1198_v40 = vrot.slane %v1197_v60, 1 }
 0x146   : > { %v1192_v51 = vadd.f32 %v1191_v5, %v1190_v21  ;;  %v1211_v18 = vadd.f32 %v1210_v37, %v1209_v59  ;;  %v1203_v22 = vrot.slane %v1202_v39, 2 }
 0x147   : > { %v1199_v43 = vadd.f32 %v1198_v40, %v1197_v60 }
 0x148   : > { %v1214_v52 = vadd.f32 1e-12, %v1192_v51  ;;  %v1226_v12 = vadd.f32 1.0, %v1192_v51  ;;  %v1212_v47 = vrot.slane %v1211_v18, 1  ;;  %v1204_v30 = vadd.f32 %v1203_v22, %v1202_v39 }
 0x149   : > { %v1215_v26 = vadd.f32 1e-12, %v1199_v43  ;;  %v1227_v27 = vadd.f32 1.0, %v1199_v43 }
 0x14a   : > { %2552 = vrsqrt.f32 %v1214_v52  ;;  %v1213_v57 = vadd.f32 %v1212_v47, %v1211_v18  ;;  %v1205_v25 = vrot.slane %v1204_v30, 1 }
 0x14b   : > { %2554 = vrcp.f32 %v1226_v12 }
 0x14c   : > { %2556 = vrsqrt.f32 %v1215_v26  ;;  %v1217_v58 = vadd.f32 1e-12, %v1213_v57  ;;  %v1206_v56 = vadd.f32 %v1205_v25, %v1204_v30  ;;  %v1229_v9 = vadd.f32 1.0, %v1213_v57 }
 0x14d   : > { %2558 = vrcp.f32 %v1227_v27 }
 0x14e   : > { %2560 = vrsqrt.f32 %v1217_v58  ;;  %v1216_v48 = vadd.f32 1e-12, %v1206_v56  ;;  %v1228_v37 = vadd.f32 1.0, %v1206_v56 }
 0x14f   : > { %2562 = vrcp.f32 %v1229_v9 }
 0x150   : > { %2564 = vrsqrt.f32 %v1216_v48 }
 0x151   : > { %2566 = vrcp.f32 %v1228_v37 }
 0x154   : > { %v2553_v4 = vpop.eup %2552 }
 0x155   : > { %v2555_v53 = vpop.eup %2554  ;;  %v1222_v3 = vmul.f32 %v2553_v4, %v1192_v51 }
 0x156   : > { %v2557_v33 = vpop.eup %2556 }
 0x157   : > { %v1234_v2 = vmul.f32 %v2555_v53, %v1222_v3  ;;  %v1223_v8 = vmul.f32 %v2557_v33, %v1199_v43  ;;  %v2559_v41 = vpop.eup %2558 }
 0x158   : > { %v2561_v39 = vpop.eup %2560 }
 0x159   : > { %v1238_v10 = vmul.f32 %v1234_v2, %v3561_v29  ;;  %v1235_v42 = vmul.f32 %v2559_v41, %v1223_v8  ;;  %v1225_v30 = vmul.f32 %v2561_v39, %v1213_v57  ;;  %v2563_v53 = vpop.eup %2562 }
 0x15a   : > { %v2565_v41 = vpop.eup %2564 }
 0x15b   : > { %v1242_v11 = vmul.f32 %v1238_v10, %v3466_v46  ;;  %v1246_v34 = vmul.f32 %v1238_v10, %v3468_v19  ;;  %v1250_v13 = vmul.f32 %v1238_v10, %v3470_v17  ;;  %v1254_v16 = vmul.f32 %v1238_v10, %v3472_v20 }
 0x15c   : > { %v1239_v44 = vmul.f32 %v1235_v42, %v3567_v50  ;;  %v1237_v48 = vmul.f32 %v2563_v53, %v1225_v30 }
 0x15d   : > { %v1258_v45 = vsel %vm1149_vm1, %v1242_v11, 0.0  ;;  %v1286_v21 = vsel %vm1149_vm1, %v1246_v34, 0.0  ;;  %v1314_v59 = vsel %vm1149_vm1, %v1250_v13, 0.0  ;;  %v1342_v29 = vsel %vm1149_vm1, %v1254_v16, 0.0 }
 0x15e   : > { %v1259_v24 = vrot.slane %v1258_v45, 4  ;;  %v1287_v60 = vrot.slane %v1286_v21, 4  ;;  %v1315_v28 = vrot.slane %v1314_v59, 4  ;;  %v1343_v5 = vrot.slane %v1342_v29, 4 }
 0x15f   : > { %v1243_v51 = vmul.f32 %v1239_v44, %v3482_v14  ;;  %v1247_v50 = vmul.f32 %v1239_v44, %v3484_v15  ;;  %v1251_v18 = vmul.f32 %v1239_v44, %v3486_v32  ;;  %v1255_v52 = vmul.f32 %v1239_v44, %v3496_v54 }
 0x160   : > { %v1260_v40 = vadd.f32 %v1259_v24, %v1258_v45  ;;  %v1288_v43 = vadd.f32 %v1287_v60, %v1286_v21  ;;  %v1316_v12 = vadd.f32 %v1315_v28, %v1314_v59  ;;  %v1344_v26 = vadd.f32 %v1343_v5, %v1342_v29  ;;  %v2567_v24 = vpop.eup %2566 }
 0x161   : > { %v1265_v22 = vsel %vm1149_vm1, %v1243_v51, 0.0  ;;  %v1293_v47 = vsel %vm1149_vm1, %v1247_v50, 0.0  ;;  %v1321_v58 = vsel %vm1149_vm1, %v1251_v18, 0.0  ;;  %v1349_v4 = vsel %vm1149_vm1, %v1255_v52, 0.0 }
 0x162   : > { %v1261_v27 = vrot.slane %v1260_v40, 2  ;;  %v1289_v25 = vrot.slane %v1288_v43, 2  ;;  %v1317_v3 = vrot.slane %v1316_v12, 2  ;;  %v1345_v33 = vrot.slane %v1344_v26, 2 }
 0x163   : > { %v1266_v2 = vrot.slane %v1265_v22, 4  ;;  %v1294_v8 = vrot.slane %v1293_v47, 4  ;;  %v1322_v10 = vrot.slane %v1321_v58, 4  ;;  %v1350_v42 = vrot.slane %v1349_v4, 4 }
 0x164   : > { %v1262_v9 = vadd.f32 %v1261_v27, %v1260_v40  ;;  %v1290_v11 = vadd.f32 %v1289_v25, %v1288_v43  ;;  %v1318_v34 = vadd.f32 %v1317_v3, %v1316_v12  ;;  %v3612_v13 = vadd.f32 %v1345_v33, %v1344_v26 }
 0x165   : > { %v1267_v57 = vadd.f32 %v1266_v2, %v1265_v22  ;;  %v1295_v16 = vadd.f32 %v1294_v8, %v1293_v47  ;;  %v1224_v44 = vmul.f32 %v2565_v41, %v1206_v56  ;;  %v1323_v21 = vadd.f32 %v1322_v10, %v1321_v58 }
 0x166   : > { %v1263_v45 = vrot.slane %v1262_v9, 1  ;;  %v1351_v59 = vadd.f32 %v1350_v42, %v1349_v4  ;;  %v1241_v29 = vmul.f32 %v1237_v48, %v3579_v6  ;;  %v1291_v60 = vrot.slane %v1290_v11, 1 }
 0x167   : > { %v1319_v28 = vrot.slane %v1318_v34, 1  ;;  %v1268_v51 = vrot.slane %v1267_v57, 2  ;;  %v1296_v50 = vrot.slane %v1295_v16, 2  ;;  %v1236_v43 = vmul.f32 %v2567_v24, %v1224_v44 }
 0x168   : > { %v1245_v5 = vmul.f32 %v1241_v29, %v3498_v55  ;;  %v1249_v37 = vmul.f32 %v1241_v29, %v3500_v62  ;;  %v1253_v40 = vmul.f32 %v1241_v29, %v3502_v61  ;;  %v1257_v39 = vmul.f32 %v1241_v29, %v3504_v0 }
 0x169   : > { %v3619_v56 = vadd.f32 %v1263_v45, %v1262_v9  ;;  %v1324_v52 = vrot.slane %v1323_v21, 2  ;;  %v1352_v6 = vrot.slane %v1351_v59, 2  ;;  %v3622_v12 = vadd.f32 %v1291_v60, %v1290_v11 }
 0x16a   : > { %v1279_v26 = vsel %vm1149_vm1, %v1245_v5, 0.0  ;;  %v1307_v27 = vsel %vm1149_vm1, %v1249_v37, 0.0  ;;  %v1335_v22 = vsel %vm1149_vm1, %v1253_v40, 0.0  ;;  %v3627_v47 = vadd.f32 %v1319_v28, %v1318_v34 }
 0x16b   : > { %4326 = vst [vmem:[#allocation22_spill] sm:$0xff] %v3622_v12  ;;  %v1280_v30 = vrot.slane %v1279_v26, 4  ;;  %v1308_v25 = vrot.slane %v1307_v27, 4  ;;  %v1336_v58 = vrot.slane %v1335_v22, 4  ;;  %v1269_v4 = vadd.f32 %v1268_v51, %v1267_v57 }
 0x16c   : > { %4327 = vst [vmem:[#allocation23_spill] sm:$0xff] %v3627_v47  ;;  %v1297_v53 = vadd.f32 %v1296_v50, %v1295_v16  ;;  %v1363_v3 = vsel %vm1149_vm1, %v1257_v39, 0.0  ;;  %v1240_v33 = vmul.f32 %v1236_v43, %v3588_v38  ;;  %v1325_v2 = vadd.f32 %v1324_v52, %v1323_v21 }
 0x16d   : > { %v1353_v8 = vadd.f32 %v1352_v6, %v1351_v59  ;;  %v1281_v41 = vadd.f32 %v1280_v30, %v1279_v26  ;;  %v1309_v9 = vadd.f32 %v1308_v25, %v1307_v27  ;;  %v1337_v57 = vadd.f32 %v1336_v58, %v1335_v22 }
 0x16e   : > { %v1244_v10 = vmul.f32 %v1240_v33, %v3506_v31  ;;  %v1248_v42 = vmul.f32 %v1240_v33, %v3508_v23  ;;  %v1252_v48 = vmul.f32 %v1240_v33, %v3510_v35  ;;  %v1256_v11 = vmul.f32 %v1240_v33, %v3520_v7 }
 0x16f   : > { %v1282_v34 = vrot.slane %v1281_v41, 2  ;;  %v1310_v44 = vrot.slane %v1309_v9, 2  ;;  %v1364_v16 = vrot.slane %v1363_v3, 4  ;;  %v1386_v29 = vsel %vm1149_vm1, %v3619_v56, -inf }
 0x170   : > { %v1272_v45 = vsel %vm1149_vm1, %v1244_v10, 0.0  ;;  %v1300_v38 = vsel %vm1149_vm1, %v1248_v42, 0.0  ;;  %v1328_v21 = vsel %vm1149_vm1, %v1252_v48, 0.0  ;;  %v1356_v59 = vsel %vm1149_vm1, %v1256_v11, 0.0 }
 0x171   : > { %v1270_v24 = vrot.slane %v1269_v4, 1  ;;  %v1298_v60 = vrot.slane %v1297_v53, 1  ;;  %v1326_v28 = vrot.slane %v1325_v2, 1  ;;  %v1273_v5 = vrot.slane %v1272_v45, 4 }
 0x172   : > { %v1301_v37 = vrot.slane %v1300_v38, 4  ;;  %v1329_v40 = vrot.slane %v1328_v21, 4  ;;  %v1357_v51 = vrot.slane %v1356_v59, 4  ;;  %v1283_v50 = vadd.f32 %v1282_v34, %v1281_v41 }
 0x173   : > { %v1311_v39 = vadd.f32 %v1310_v44, %v1309_v9  ;;  %v1338_v43 = vrot.slane %v1337_v57, 2  ;;  %v1365_v52 = vadd.f32 %v1364_v16, %v1363_v3  ;;  %v1274_v6 = vadd.f32 %v1273_v5, %v1272_v45 }
 0x174   : > { %v1302_v26 = vadd.f32 %v1301_v37, %v1300_v38  ;;  %v1330_v27 = vadd.f32 %v1329_v40, %v1328_v21  ;;  %v1358_v22 = vadd.f32 %v1357_v51, %v1356_v59  ;;  %v3641_v30 = vadd.f32 %v1270_v24, %v1269_v4 }
 0x175   : > { %v3643_v25 = vadd.f32 %v1298_v60, %v1297_v53  ;;  %v3645_v58 = vadd.f32 %v1326_v28, %v1325_v2  ;;  %v1354_v33 = vrot.slane %v1353_v8, 1  ;;  %v1275_v10 = vrot.slane %v1274_v6, 2 }
 0x176   : > { %v1303_v42 = vrot.slane %v1302_v26, 2  ;;  %v1331_v48 = vrot.slane %v1330_v27, 2  ;;  %v1359_v11 = vrot.slane %v1358_v22, 2  ;;  %v1284_v18 = vrot.slane %v1283_v50, 1 }
 0x177   : > { %4328 = vst [vmem:[#allocation24_spill] sm:$0xff] %v3643_v25  ;;  %4329 = vst [vmem:[#allocation25_spill] sm:$0xff] %v3645_v58  ;;  %v1312_v41 = vrot.slane %v1311_v39, 1  ;;  %v1339_v9 = vadd.f32 %v1338_v43, %v1337_v57  ;;  %v1366_v34 = vrot.slane %v1365_v52, 2  ;;  %v1276_v3 = vadd.f32 %v1275_v10, %v1274_v6 }
 0x178   : > { %v1304_v44 = vadd.f32 %v1303_v42, %v1302_v26  ;;  %v1332_v16 = vadd.f32 %v1331_v48, %v1330_v27  ;;  %v1360_v45 = vadd.f32 %v1359_v11, %v1358_v22  ;;  %v1393_v4 = vsel %vm1149_vm1, %v3622_v12, -inf }
 0x179   : > { %v3649_v53 = vadd.f32 %v1354_v33, %v1353_v8  ;;  %v1387_v2 = vsel %vm1149_vm1, %v3641_v30, -inf  ;;  %v1394_v38 = vsel %vm1149_vm1, %v3643_v25, -inf  ;;  %v1277_v21 = vrot.slane %v1276_v3, 1 }
 0x17a   : > { %v1305_v59 = vrot.slane %v1304_v44, 1  ;;  %v1333_v24 = vrot.slane %v1332_v16, 1  ;;  %v1361_v57 = vrot.slane %v1360_v45, 1  ;;  %v1401_v60 = vsel %vm1149_vm1, %v3645_v58, -inf }
 0x17b   : > { %4330 = vst [vmem:[#allocation26_spill] sm:$0xff] %v3649_v53  ;;  %v3657_v28 = vadd.f32 %v1284_v18, %v1283_v50  ;;  %v1340_v5 = vrot.slane %v1339_v9, 1  ;;  %v1367_v37 = vadd.f32 %v1366_v34, %v1365_v52  ;;  %v3659_v40 = vadd.f32 %v1312_v41, %v1311_v39 }
 0x17c   : > { %v3661_v8 = vadd.f32 %v1277_v21, %v1276_v3  ;;  %v3663_v51 = vadd.f32 %v1305_v59, %v1304_v44  ;;  %v3665_v43 = vadd.f32 %v1333_v24, %v1332_v16  ;;  %v4334_v6 = vrot.slane %v3612_v13, 1 }
 0x17d   : > { %4331 = vst [vmem:[#allocation27_spill] sm:$0xff] %v3659_v40  ;;  %v1400_v27 = vsel %vm1149_vm1, %v3627_v47, -inf  ;;  %v1388_v18 = vmax.f32 %v1386_v29, %v1387_v2  ;;  %v1395_v50 = vmax.f32 %v1393_v4, %v1394_v38  ;;  %v3674_v22 = vadd.f32 %v1361_v57, %v1360_v45 }
 0x17e   : > { %4332 = vst [vmem:[#allocation28_spill] sm:$0xff] %v3663_v51  ;;  %4333 = vst [vmem:[#allocation29_spill] sm:$0xff] %v3665_v43  ;;  %v3670_v26 = vadd.f32 %v4334_v6, %v3612_v13  ;;  %v1389_v39 = vsel %vm1149_vm1, %v3661_v8, -inf  ;;  %v1396_v52 = vsel %vm1149_vm1, %v3663_v51, -inf  ;;  %v1403_v33 = vsel %vm1149_vm1, %v3665_v43, -inf }
 0x17f   : > { %4336 = vst [vmem:[#allocation31_spill] sm:$0xff] %v3674_v22  ;;  %v1402_v10 = vmax.f32 %v1400_v27, %v1401_v60  ;;  %v1408_v13 = vsel %vm1149_vm1, %v3649_v53, -inf  ;;  %v1390_v42 = vmax.f32 %v1388_v18, %v1389_v39  ;;  %v1397_v48 = vmax.f32 %v1395_v50, %v1396_v52 }
 0x180   : > { %4335 = vst [vmem:[#allocation30_spill] sm:$0xff] %v3670_v26  ;;  %v3684_v11 = vadd.f32 %v1340_v5, %v1339_v9  ;;  %v1368_v29 = vrot.slane %v1367_v37, 1  ;;  %v1391_v41 = vsel %vm1149_vm1, %v3657_v28, -inf  ;;  %v1398_v34 = vsel %vm1149_vm1, %v3659_v40, -inf }
 0x181   : > { %v1392_v3 = vmax.f32 %v1390_v42, %v1391_v41  ;;  %v1399_v44 = vmax.f32 %v1397_v48, %v1398_v34  ;;  %v1404_v16 = vmax.f32 %v1402_v10, %v1403_v33  ;;  %v1407_v45 = vsel %vm1149_vm1, %v3670_v26, -inf }
 0x182   : > { %4337 = vst [vmem:[#allocation32_spill] sm:$0xff] %v3684_v11  ;;  %v1410_v4 = vsel %vm1149_vm1, %v3674_v22, -inf  ;;  %v1409_v2 = vmax.f32 %v1407_v45, %v1408_v13  ;;  %v3697_v59 = vadd.f32 %v1368_v29, %v1367_v37  ;;  %v1405_v24 = vsel %vm1149_vm1, %v3684_v11, -inf }
 0x183   : > { %v1414_v9 = vsub.f32 %v3619_v56, %v1392_v3  ;;  %v1415_v38 = vsub.f32 %v3641_v30, %v1392_v3  ;;  %v1416_v21 = vsub.f32 %v3661_v8, %v1392_v3  ;;  %v1417_v57 = vsub.f32 %v3657_v28, %v1392_v3 }
 0x184   : > { %4338 = vst [vmem:[#allocation33_spill] sm:$0xff] %v3697_v59  ;;  %v1406_v60 = vmax.f32 %v1404_v16, %v1405_v24  ;;  %v1411_v5 = vmax.f32 %v1409_v2, %v1410_v4  ;;  %v1418_v6 = vsub.f32 %v3622_v12, %v1399_v44  ;;  %v1419_v27 = vsub.f32 %v3643_v25, %v1399_v44 }
 0x185   : > { %v1420_v18 = vsub.f32 %v3663_v51, %v1399_v44  ;;  %v1430_v50 = vmul.f32 1.442695, %v1414_v9  ;;  %v1432_v39 = vmul.f32 1.442695, %v1415_v38  ;;  %v1434_v52 = vmul.f32 1.442695, %v1416_v21 }
 0x186   : > { %v1412_v37 = vsel %vm1149_vm1, %v3697_v59, -inf  ;;  %v1421_v33 = vsub.f32 %v3659_v40, %v1399_v44  ;;  %v1436_v10 = vmul.f32 1.442695, %v1417_v57  ;;  %v1422_v42 = vsub.f32 %v3627_v47, %v1406_v60 }
 0x187   : > { %v1413_v13 = vmax.f32 %v1411_v5, %v1412_v37  ;;  %2568 = vpow2.f32 %v1430_v50  ;;  %v1438_v48 = vmul.f32 1.442695, %v1418_v6  ;;  %v1423_v29 = vsub.f32 %v3645_v58, %v1406_v60 }
 0x188   : > { %2570 = vpow2.f32 %v1432_v39  ;;  %v1440_v41 = vmul.f32 1.442695, %v1419_v27  ;;  %v1424_v34 = vsub.f32 %v3665_v43, %v1406_v60  ;;  %v1442_v3 = vmul.f32 1.442695, %v1420_v18 }
 0x189   : > { %2572 = vpow2.f32 %v1434_v52  ;;  %v1425_v16 = vsub.f32 %v3684_v11, %v1406_v60  ;;  %v1444_v45 = vmul.f32 1.442695, %v1421_v33  ;;  %v1426_v44 = vsub.f32 %v3670_v26, %v1413_v13 }
 0x18a   : > { %2574 = vpow2.f32 %v1436_v10  ;;  %v1446_v4 = vmul.f32 1.442695, %v1422_v42  ;;  %v1427_v2 = vsub.f32 %v3649_v53, %v1413_v13  ;;  %v1448_v9 = vmul.f32 1.442695, %v1423_v29 }
 0x18b   : > { %2576 = vpow2.f32 %v1438_v48  ;;  %v1428_v38 = vsub.f32 %v3674_v22, %v1413_v13  ;;  %v1450_v21 = vmul.f32 1.442695, %v1424_v34  ;;  %v1429_v24 = vsub.f32 %v3697_v59, %v1413_v13 }
 0x18c   : > { %2578 = vpow2.f32 %v1440_v41  ;;  %v1452_v57 = vmul.f32 1.442695, %v1425_v16  ;;  %v1454_v60 = vmul.f32 1.442695, %v1426_v44  ;;  %v1456_v5 = vmul.f32 1.442695, %v1427_v2 }
 0x18d   : > { %2580 = vpow2.f32 %v1442_v3  ;;  %v1458_v27 = vmul.f32 1.442695, %v1428_v38  ;;  %v1460_v50 = vmul.f32 1.442695, %v1429_v24 }
 0x18e   : > { %2582 = vpow2.f32 %v1444_v45 }
 0x18f   : > { %2584 = vpow2.f32 %v1446_v4 }
 0x190   : > { %2586 = vpow2.f32 %v1448_v9 }
 0x191   : > { %v3716_v6 = vpop.eup %2568  ;;  %2588 = vpow2.f32 %v1450_v21 }
 0x192   : > { %v3718_v18 = vpop.eup %2570  ;;  %2590 = vpow2.f32 %v1452_v57 }
 0x193   : > { %v3720_v39 = vpop.eup %2572  ;;  %2592 = vpow2.f32 %v1454_v60  ;;  %v1478_v52 = vrot.slane %v3718_v18, 7 }
 0x194   : > { %v3723_v37 = vpop.eup %2574  ;;  %2594 = vpow2.f32 %v1456_v5  ;;  %v1481_v33 = vrot.slane %v3720_v39, 6 }
 0x195   : > { %v3726_v10 = vpop.eup %2576  ;;  %2596 = vpow2.f32 %v1458_v27  ;;  %v1480_v13 = vsel %vm1479_vm2, %v1478_v52, %v3716_v6  ;;  %v1484_v42 = vrot.slane %v3723_v37, 5 }
 0x196   : > { %v3731_v48 = vpop.eup %2578  ;;  %2598 = vpow2.f32 %v1460_v50  ;;  %v1483_v29 = vsel %vm1482_vm3, %v1481_v33, %v1480_v13 }
 0x197   : > { %v3734_v41 = vpop.eup %2580  ;;  %v1486_v34 = vsel %vm1485_vm4, %v1484_v42, %v1483_v29  ;;  %v1487_v3 = vrot.slane %v3731_v48, 7 }
 0x198   : > { %v3738_v16 = vpop.eup %2582  ;;  %v1489_v45 = vrot.slane %v3734_v41, 6  ;;  %v1510_v44 = vsel %vm1509_vm5, %v1486_v34, 0.0 }
 0x199   : > { %v3742_v4 = vpop.eup %2584  ;;  %v1488_v2 = vsel %vm1479_vm2, %v1487_v3, %v3726_v10  ;;  %v1491_v9 = vrot.slane %v3738_v16, 5  ;;  %v1511_v38 = vrot.slane %v1510_v44, 4 }
 0x19a   : > { %v3747_v21 = vpop.eup %2586  ;;  %v1490_v24 = vsel %vm1482_vm3, %v1489_v45, %v1488_v2 }
 0x19b   : > { %v3750_v57 = vpop.eup %2588  ;;  %v1492_v60 = vsel %vm1485_vm4, %v1491_v9, %v1490_v24  ;;  %v1493_v5 = vrot.slane %v3747_v21, 7  ;;  %v1512_v27 = vadd.f32 %v1511_v38, %v1510_v44 }
 0x19c   : > { %v3754_v50 = vpop.eup %2590  ;;  %v1495_v52 = vrot.slane %v3750_v57, 6  ;;  %v1517_v33 = vsel %vm1509_vm5, %v1492_v60, 0.0 }
 0x19d   : > { %v3758_v13 = vpop.eup %2592  ;;  %v1494_v42 = vsel %vm1479_vm2, %v1493_v5, %v3742_v4  ;;  %v1497_v29 = vrot.slane %v3754_v50, 5  ;;  %v1513_v34 = vrot.slane %v1512_v27, 2  ;;  %v1518_v3 = vrot.slane %v1517_v33, 4 }
 0x19e   : > { %v3763_v45 = vpop.eup %2594  ;;  %v1496_v2 = vsel %vm1482_vm3, %v1495_v52, %v1494_v42 }
 0x19f   : > { %v3766_v44 = vpop.eup %2596  ;;  %v1498_v9 = vsel %vm1485_vm4, %v1497_v29, %v1496_v2  ;;  %v1499_v38 = vrot.slane %v3763_v45, 7  ;;  %v1514_v24 = vadd.f32 %v1513_v34, %v1512_v27  ;;  %v1519_v60 = vadd.f32 %v1518_v3, %v1517_v33 }
 0x1a0   : > { %v3770_v59 = vpop.eup %2598  ;;  %v1501_v5 = vrot.slane %v3766_v44, 6  ;;  %v1524_v22 = vsel %vm1509_vm5, %v1498_v9, 0.0 }
 0x1a1   : > { %v1500_v53 = vsel %vm1479_vm2, %v1499_v38, %v3758_v13  ;;  %v1503_v11 = vrot.slane %v3770_v59, 5  ;;  %v1515_v52 = vrot.slane %v1514_v24, 1  ;;  %v1520_v42 = vrot.slane %v1519_v60, 2 }
 0x1a2   : > { %v1502_v26 = vsel %vm1482_vm3, %v1501_v5, %v1500_v53  ;;  %v1525_v29 = vrot.slane %v1524_v22, 4 }
 0x1a3   : > { %v1504_v2 = vsel %vm1485_vm4, %v1503_v11, %v1502_v26  ;;  %v1516_v27 = vadd.f32 %v1515_v52, %v1514_v24  ;;  %v1521_v33 = vadd.f32 %v1520_v42, %v1519_v60  ;;  %v4339_v24 = vld [vmem:[#allocation15_spill] sm:$0xff] }
 0x1a4   : > { %v1526_v34 = vadd.f32 %v1525_v29, %v1524_v22  ;;  %v1531_v3 = vsel %vm1509_vm5, %v1504_v2, 0.0 }
 0x1a5   : > { %v1522_v43 = vrot.slane %v1521_v33, 1  ;;  %v1532_v58 = vrot.slane %v1531_v3, 4  ;;  %2600 = vrcp.f32 %v1516_v27 }
 0x1a6   : > { %v1527_v9 = vrot.slane %v1526_v34, 2 }
 0x1a7   : > { %v1523_v47 = vadd.f32 %v1522_v43, %v1521_v33  ;;  %v1533_v38 = vadd.f32 %v1532_v58, %v1531_v3 }
 0x1a8   : > { %v1528_v40 = vadd.f32 %v1527_v9, %v1526_v34 }
 0x1a9   : > { %v1534_v51 = vrot.slane %v1533_v38, 2  ;;  %2602 = vrcp.f32 %v1523_v47 }
 0x1aa   : > { %v1529_v25 = vrot.slane %v1528_v40, 1 }
 0x1ab   : > { %v1535_v12 = vadd.f32 %v1534_v51, %v1533_v38 }
 0x1ac   : > { %v1530_v53 = vadd.f32 %v1529_v25, %v1528_v40 }
 0x1ad   : > { %v1536_v5 = vrot.slane %v1535_v12, 1 }
 0x1ae   : > { %2604 = vrcp.f32 %v1530_v53 }
 0x1af   : > { %v2601_v26 = vpop.eup %2600  ;;  %v1537_v11 = vadd.f32 %v1536_v5, %v1535_v12 }
 0x1b0   : > { %v1545_v22 = vrot.slane %v2601_v26, %v4339_v24 }
 0x1b1   : > { %2606 = vrcp.f32 %v1537_v11 }
 0x1b2   : > { %v1558_v60 = vmul.f32 %v3716_v6, %v1545_v22  ;;  %v1559_v52 = vmul.f32 %v3718_v18, %v1545_v22  ;;  %v1560_v43 = vmul.f32 %v3720_v39, %v1545_v22  ;;  %v1561_v58 = vmul.f32 %v3723_v37, %v1545_v22 }
 0x1b3   : > { %v2603_v42 = vpop.eup %2602 }
 0x1b4   : > { %v1549_v47 = vrot.slane %v2603_v42, %v4339_v24  ;;  %v1577_v25 = vrot.slane %v1558_v60, %v4339_v24  ;;  %v1581_v40 = vrot.slane %v1559_v52, %v4339_v24  ;;  %v1585_v12 = vrot.slane %v1560_v43, %v4339_v24 }
 0x1b5   : > { %v1589_v51 = vrot.slane %v1561_v58, %v4339_v24 }
 0x1b6   : > { %v1562_v29 = vmul.f32 %v3726_v10, %v1549_v47  ;;  %v1563_v6 = vmul.f32 %v3731_v48, %v1549_v47  ;;  %v1564_v18 = vmul.f32 %v3734_v41, %v1549_v47  ;;  %v1565_v39 = vmul.f32 %v3738_v16, %v1549_v47 }
 0x1b7   : > { %v1638_v37 = vmul.f32 %v1577_v25, %v3466_v46  ;;  %v1639_v2 = vmul.f32 %v1581_v40, %v3482_v14  ;;  %v1640_v27 = vmul.f32 %v1585_v12, %v3506_v31  ;;  %v1641_v41 = vmul.f32 %v1589_v51, %v3498_v55 }
 0x1b8   : > { %v2605_v33 = vpop.eup %2604  ;;  %v1593_v34 = vrot.slane %v1562_v29, %v4339_v24  ;;  %v1597_v3 = vrot.slane %v1563_v6, %v4339_v24  ;;  %v1601_v9 = vrot.slane %v1564_v18, %v4339_v24  ;;  %v1605_v10 = vrot.slane %v1565_v39, %v4339_v24 }
 0x1b9   : > { %v1553_v48 = vrot.slane %v2605_v33, %v4339_v24  ;;  %v1654_v16 = vsel %vm1149_vm1, %v1638_v37, 0.0  ;;  %v1661_v38 = vsel %vm1149_vm1, %v1639_v2, 0.0  ;;  %v1668_v11 = vsel %vm1149_vm1, %v1640_v27, 0.0 }
 0x1ba   : > { %v1642_v53 = vmul.f32 %v1593_v34, %v3468_v19  ;;  %v1643_v5 = vmul.f32 %v1597_v3, %v3484_v15  ;;  %v1644_v26 = vmul.f32 %v1601_v9, %v3508_v23  ;;  %v1645_v47 = vmul.f32 %v1605_v10, %v3500_v62 }
 0x1bb   : > { %v2607_v22 = vpop.eup %2606  ;;  %v1566_v60 = vmul.f32 %v3742_v4, %v1553_v48  ;;  %v1567_v52 = vmul.f32 %v3747_v21, %v1553_v48  ;;  %v1568_v43 = vmul.f32 %v3750_v57, %v1553_v48  ;;  %v1569_v58 = vmul.f32 %v3754_v50, %v1553_v48 }
 0x1bc   : > { %v1557_v42 = vrot.slane %v2607_v22, %v4339_v24  ;;  %v1655_v25 = vsel %vm1149_vm1, %v1642_v53, 0.0  ;;  %v1662_v40 = vsel %vm1149_vm1, %v1643_v5, 0.0  ;;  %v1669_v2 = vsel %vm1149_vm1, %v1644_v26, 0.0 }
 0x1bd   : > { %v1609_v12 = vrot.slane %v1566_v60, %v4339_v24  ;;  %v1613_v51 = vrot.slane %v1567_v52, %v4339_v24  ;;  %v1617_v4 = vrot.slane %v1568_v43, %v4339_v24  ;;  %v1621_v21 = vrot.slane %v1569_v58, %v4339_v24 }
 0x1be   : > { %v1570_v57 = vmul.f32 %v3758_v13, %v1557_v42  ;;  %v1571_v50 = vmul.f32 %v3763_v45, %v1557_v42  ;;  %v1572_v29 = vmul.f32 %v3766_v44, %v1557_v42  ;;  %v1573_v6 = vmul.f32 %v3770_v59, %v1557_v42 }
 0x1bf   : > { %v1646_v18 = vmul.f32 %v1609_v12, %v3470_v17  ;;  %v1647_v39 = vmul.f32 %v1613_v51, %v3486_v32  ;;  %v1648_v37 = vmul.f32 %v1617_v4, %v3510_v35  ;;  %v1649_v44 = vmul.f32 %v1621_v21, %v3502_v61 }
 0x1c0   : > { %v1625_v27 = vrot.slane %v1570_v57, %v4339_v24  ;;  %v1629_v33 = vrot.slane %v1571_v50, %v4339_v24  ;;  %v1633_v13 = vrot.slane %v1572_v29, %v4339_v24  ;;  %v1637_v45 = vrot.slane %v1573_v6, %v4339_v24 }
 0x1c1   : > { %v1656_v34 = vadd.f32 %v1655_v25, %v1654_v16  ;;  %v1657_v59 = vsel %vm1149_vm1, %v1646_v18, 0.0  ;;  %v1663_v3 = vadd.f32 %v1662_v40, %v1661_v38  ;;  %v1664_v53 = vsel %vm1149_vm1, %v1647_v39, 0.0 }
 0x1c2   : > { %v1650_v9 = vmul.f32 %v1625_v27, %v3472_v20  ;;  %v1651_v10 = vmul.f32 %v1629_v33, %v3496_v54  ;;  %v1652_v48 = vmul.f32 %v1633_v13, %v3520_v7  ;;  %v1653_v5 = vmul.f32 %v1637_v45, %v3504_v0 }
 0x1c3   : > { %v1658_v26 = vadd.f32 %v1657_v59, %v1656_v34  ;;  %v1665_v22 = vadd.f32 %v1664_v53, %v1663_v3  ;;  %v1670_v60 = vadd.f32 %v1669_v2, %v1668_v11  ;;  %v1671_v43 = vsel %vm1149_vm1, %v1648_v37, 0.0 }
 0x1c4   : > { %v1659_v52 = vsel %vm1149_vm1, %v1650_v9, 0.0  ;;  %v1666_v16 = vsel %vm1149_vm1, %v1651_v10, 0.0  ;;  %v1675_v38 = vsel %vm1149_vm1, %v1641_v41, 0.0  ;;  %v1676_v40 = vsel %vm1149_vm1, %v1645_v47, 0.0 }
 0x1c5   : > { %v1660_v58 = vadd.f32 %v1659_v52, %v1658_v26  ;;  %v1667_v42 = vadd.f32 %v1666_v16, %v1665_v22  ;;  %v1672_v25 = vadd.f32 %v1671_v43, %v1670_v60  ;;  %v1673_v12 = vsel %vm1149_vm1, %v1652_v48, 0.0 }
 0x1c6   : > { %v1677_v51 = vadd.f32 %v1676_v40, %v1675_v38  ;;  %v1678_v21 = vsel %vm1149_vm1, %v1649_v44, 0.0  ;;  %v1680_v41 = vsel %vm1149_vm1, %v1653_v5, 0.0 }
 0x1c7   : > { %v1674_v4 = vadd.f32 %v1673_v12, %v1672_v25  ;;  %v3848_v11 = vadd.f32 %v1660_v58, %v3549_v63  ;;  %v3851_v57 = vadd.f32 %v1667_v42, %v3536_v1 }
 0x1c8   : > { %v1679_v50 = vadd.f32 %v1678_v21, %v1677_v51 }
 0x1c9   : > { %v3855_v29 = vadd.f32 %v1674_v4, %v3581_v36  ;;  %v1686_v47 = vmul.f32 %v3848_v11, %v3848_v11  ;;  %v1687_v6 = vmul.f32 %v3851_v57, %v3851_v57 }
 0x1ca   : > { %v1681_v18 = vadd.f32 %v1680_v41, %v1679_v50 }
 0x1cb   : > { %v1688_v39 = vmul.f32 %v3855_v29, %v3855_v29  ;;  %v1690_v37 = vsel %vm1149_vm1, %v1686_v47, 0.0  ;;  %v1697_v2 = vsel %vm1149_vm1, %v1687_v6, 0.0 }
 0x1cc   : > { %v3866_v27 = vadd.f32 %v1681_v18, %v3569_v49  ;;  %v1691_v33 = vrot.slane %v1690_v37, 4  ;;  %v1698_v13 = vrot.slane %v1697_v2, 4 }
 0x1cd   : > { %v1704_v45 = vsel %vm1149_vm1, %v1688_v39, 0.0 }
 0x1ce   : > { %v1689_v44 = vmul.f32 %v3866_v27, %v3866_v27  ;;  %v1692_v34 = vadd.f32 %v1691_v33, %v1690_v37  ;;  %v1699_v59 = vadd.f32 %v1698_v13, %v1697_v2  ;;  %v1705_v3 = vrot.slane %v1704_v45, 4 }
 0x1d0   : > { %v1693_v9 = vrot.slane %v1692_v34, 2  ;;  %v1700_v10 = vrot.slane %v1699_v59, 2  ;;  %v1706_v48 = vadd.f32 %v1705_v3, %v1704_v45  ;;  %v1711_v53 = vsel %vm1149_vm1, %v1689_v44, 0.0 }
 0x1d1   : > { %v1712_v5 = vrot.slane %v1711_v53, 4 }
 0x1d2   : > { %v1694_v26 = vadd.f32 %v1693_v9, %v1692_v34  ;;  %v1701_v22 = vadd.f32 %v1700_v10, %v1699_v59  ;;  %v1707_v60 = vrot.slane %v1706_v48, 2 }
 0x1d3   : > { %v1713_v52 = vadd.f32 %v1712_v5, %v1711_v53 }
 0x1d4   : > { %v1695_v16 = vrot.slane %v1694_v26, 1  ;;  %v1702_v43 = vrot.slane %v1701_v22, 1  ;;  %v1708_v38 = vadd.f32 %v1707_v60, %v1706_v48 }
 0x1d5   : > { %v1714_v58 = vrot.slane %v1713_v52, 2 }
 0x1d6   : > { %v1696_v42 = vadd.f32 %v1695_v16, %v1694_v26  ;;  %v1703_v25 = vadd.f32 %v1702_v43, %v1701_v22  ;;  %v1709_v40 = vrot.slane %v1708_v38, 1 }
 0x1d7   : > { %v1715_v12 = vadd.f32 %v1714_v58, %v1713_v52 }
 0x1d8   : > { %v1710_v51 = vadd.f32 %v1709_v40, %v1708_v38  ;;  %v1718_v4 = vadd.f32 1e-12, %v1696_v42  ;;  %v1719_v21 = vadd.f32 1e-12, %v1703_v25  ;;  %v1730_v41 = vadd.f32 1.0, %v1696_v42 }
 0x1d9   : > { %v1716_v50 = vrot.slane %v1715_v12, 1  ;;  %v1731_v6 = vadd.f32 1.0, %v1703_v25 }
 0x1da   : > { %v1720_v47 = vadd.f32 1e-12, %v1710_v51  ;;  %2608 = vrsqrt.f32 %v1718_v4  ;;  %v1732_v39 = vadd.f32 1.0, %v1710_v51 }
 0x1db   : > { %v1717_v18 = vadd.f32 %v1716_v50, %v1715_v12  ;;  %2610 = vrsqrt.f32 %v1719_v21 }
 0x1dc   : > { %2612 = vrsqrt.f32 %v1720_v47 }
 0x1dd   : > { %v1721_v37 = vadd.f32 1e-12, %v1717_v18  ;;  %v1733_v2 = vadd.f32 1.0, %v1717_v18  ;;  %2614 = vrcp.f32 %v1730_v41 }
 0x1de   : > { %2616 = vrcp.f32 %v1731_v6 }
 0x1df   : > { %2618 = vrsqrt.f32 %v1721_v37 }
 0x1e0   : > { %2620 = vrcp.f32 %v1732_v39 }
 0x1e1   : > { %2622 = vrcp.f32 %v1733_v2 }
 0x1e4   : > { %v2609_v33 = vpop.eup %2608 }
 0x1e5   : > { %v2611_v13 = vpop.eup %2610  ;;  %v1726_v45 = vmul.f32 %v2609_v33, %v1696_v42 }
 0x1e6   : > { %v2613_v44 = vpop.eup %2612  ;;  %v1727_v34 = vmul.f32 %v2611_v13, %v1703_v25 }
 0x1e7   : > { %v2615_v59 = vpop.eup %2614  ;;  %v1728_v3 = vmul.f32 %v2613_v44, %v1710_v51 }
 0x1e8   : > { %v2617_v9 = vpop.eup %2616  ;;  %v1738_v10 = vmul.f32 %v2615_v59, %v1726_v45 }
 0x1e9   : > { %v2619_v48 = vpop.eup %2618  ;;  %v1739_v53 = vmul.f32 %v2617_v9, %v1727_v34 }
 0x1ea   : > { %v2621_v5 = vpop.eup %2620  ;;  %v1729_v26 = vmul.f32 %v2619_v48, %v1717_v18  ;;  %v1742_v22 = vmul.f32 %v1738_v10, %v3848_v11 }
 0x1eb   : > { %v2623_v60 = vpop.eup %2622  ;;  %v1740_v52 = vmul.f32 %v2621_v5, %v1728_v3  ;;  %v1743_v16 = vmul.f32 %v1739_v53, %v3851_v57 }
 0x1ec   : > { %v1741_v43 = vmul.f32 %v2623_v60, %v1729_v26  ;;  %v1746_v38 = vmul.f32 %v1742_v22, %v3466_v46  ;;  %v1750_v25 = vmul.f32 %v1742_v22, %v3468_v19  ;;  %v1754_v51 = vmul.f32 %v1742_v22, %v3470_v17 }
 0x1ed   : > { %v1744_v58 = vmul.f32 %v1740_v52, %v3855_v29  ;;  %v1747_v42 = vmul.f32 %v1743_v16, %v3482_v14  ;;  %v1751_v12 = vmul.f32 %v1743_v16, %v3484_v15  ;;  %v1755_v21 = vmul.f32 %v1743_v16, %v3486_v32 }
 0x1ee   : > { %v1745_v40 = vmul.f32 %v1741_v43, %v3866_v27  ;;  %v1762_v11 = vsel %vm1149_vm1, %v1746_v38, 0.0  ;;  %v3886_v29 = vmul.f32 %v1742_v22, %v3472_v20  ;;  %v3892_v47 = vmul.f32 %v1743_v16, %v3496_v54 }
 0x1ef   : > { %v1748_v4 = vmul.f32 %v1744_v58, %v3506_v31  ;;  %v1752_v57 = vmul.f32 %v1744_v58, %v3508_v23  ;;  %v1756_v27 = vmul.f32 %v1744_v58, %v3510_v35  ;;  %v1763_v6 = vrot.slane %v1762_v11, 4 }
 0x1f0   : > { %v1749_v50 = vmul.f32 %v1745_v40, %v3498_v55  ;;  %v1753_v41 = vmul.f32 %v1745_v40, %v3500_v62  ;;  %v1769_v18 = vsel %vm1149_vm1, %v1747_v42, 0.0  ;;  %v1790_v37 = vsel %vm1149_vm1, %v1750_v25, 0.0 }
 0x1f1   : > { %v1776_v39 = vsel %vm1149_vm1, %v1748_v4, 0.0  ;;  %v1770_v2 = vrot.slane %v1769_v18, 4  ;;  %v1791_v45 = vrot.slane %v1790_v37, 4  ;;  %v1764_v44 = vadd.f32 %v1763_v6, %v1762_v11 }
 0x1f2   : > { %v1777_v33 = vrot.slane %v1776_v39, 4  ;;  %v1783_v13 = vsel %vm1149_vm1, %v1749_v50, 0.0  ;;  %v1797_v59 = vsel %vm1149_vm1, %v1751_v12, 0.0  ;;  %v1804_v3 = vsel %vm1149_vm1, %v1752_v57, 0.0 }
 0x1f3   : > { %v1784_v34 = vrot.slane %v1783_v13, 4  ;;  %v1771_v9 = vadd.f32 %v1770_v2, %v1769_v18  ;;  %v1792_v48 = vadd.f32 %v1791_v45, %v1790_v37  ;;  %v1798_v53 = vrot.slane %v1797_v59, 4 }
 0x1f4   : > { %v1778_v10 = vadd.f32 %v1777_v33, %v1776_v39  ;;  %v1765_v5 = vrot.slane %v1764_v44, 2  ;;  %v1805_v22 = vrot.slane %v1804_v3, 4  ;;  %v1811_v60 = vsel %vm1149_vm1, %v1753_v41, 0.0 }
 0x1f5   : > { %v1785_v26 = vadd.f32 %v1784_v34, %v1783_v13  ;;  %v1772_v52 = vrot.slane %v1771_v9, 2  ;;  %v1793_v43 = vrot.slane %v1792_v48, 2  ;;  %v1799_v38 = vadd.f32 %v1798_v53, %v1797_v59 }
 0x1f6   : > { %v1779_v16 = vrot.slane %v1778_v10, 2  ;;  %v1766_v42 = vadd.f32 %v1765_v5, %v1764_v44  ;;  %v1806_v11 = vadd.f32 %v1805_v22, %v1804_v3  ;;  %v1812_v4 = vrot.slane %v1811_v60, 4 }
 0x1f7   : > { %v1786_v25 = vrot.slane %v1785_v26, 2  ;;  %v1773_v12 = vadd.f32 %v1772_v52, %v1771_v9  ;;  %v1794_v57 = vadd.f32 %v1793_v43, %v1792_v48  ;;  %v1800_v6 = vrot.slane %v1799_v38, 2 }
 0x1f8   : > { %v1780_v50 = vadd.f32 %v1779_v16, %v1778_v10  ;;  %v1767_v18 = vrot.slane %v1766_v42, 1  ;;  %v1807_v37 = vrot.slane %v1806_v11, 2  ;;  %v1813_v2 = vadd.f32 %v1812_v4, %v1811_v60 }
 0x1f9   : > { %v1787_v39 = vadd.f32 %v1786_v25, %v1785_v26  ;;  %v1774_v33 = vrot.slane %v1773_v12, 1  ;;  %v1795_v45 = vrot.slane %v1794_v57, 1  ;;  %v1801_v41 = vadd.f32 %v1800_v6, %v1799_v38 }
 0x1fa   : > { %v1781_v13 = vrot.slane %v1780_v50, 1  ;;  %v1760_v34 = vmul.f32 %v1744_v58, %v3520_v7  ;;  %v1808_v59 = vadd.f32 %v1807_v37, %v1806_v11  ;;  %v1814_v44 = vrot.slane %v1813_v2, 2 }
 0x1fb   : > { %v1788_v49 = vrot.slane %v1787_v39, 1  ;;  %v1757_v3 = vmul.f32 %v1745_v40, %v3502_v61  ;;  %v1761_v9 = vmul.f32 %v1745_v40, %v3504_v0  ;;  %v1768_v10 = vadd.f32 %v1767_v18, %v1766_v42 }
 0x1fc   : > { %v3904_v48 = vadd.f32 %v1774_v33, %v1773_v12  ;;  %v3906_v53 = vadd.f32 %v1781_v13, %v1780_v50  ;;  %v3908_v5 = vadd.f32 %v1795_v45, %v1794_v57  ;;  %v1815_v26 = vadd.f32 %v1814_v44, %v1813_v2 }
 0x1fd   : > { %v1818_v22 = vsel %vm1149_vm1, %v1754_v51, 0.0  ;;  %v1802_v60 = vrot.slane %v1801_v41, 1  ;;  %v1825_v58 = vsel %vm1149_vm1, %v1755_v21, 0.0  ;;  %v1832_v16 = vsel %vm1149_vm1, %v1756_v27, 0.0 }
 0x1fe   : > { %v1819_v52 = vrot.slane %v1818_v22, 4  ;;  %v1789_v43 = vadd.f32 %v1788_v49, %v1787_v39  ;;  %v1809_v38 = vrot.slane %v1808_v59, 1  ;;  %v1826_v25 = vrot.slane %v1825_v58, 4 }
 0x1ff   : > { %v1833_v40 = vrot.slane %v1832_v16, 4  ;;  %v1839_v11 = vsel %vm1149_vm1, %v1757_v3, 0.0  ;;  %v1846_v4 = vsel %vm1149_vm1, %v3886_v29, 0.0  ;;  %v1853_v12 = vsel %vm1149_vm1, %v3892_v47, 0.0 }
 0x200   : > { %v1820_v42 = vadd.f32 %v1819_v52, %v1818_v22  ;;  %v1816_v51 = vrot.slane %v1815_v26, 1  ;;  %v1827_v50 = vadd.f32 %v1826_v25, %v1825_v58  ;;  %v1840_v6 = vrot.slane %v1839_v11, 4 }
 0x201   : > { %v1834_v57 = vadd.f32 %v1833_v40, %v1832_v16  ;;  %v1847_v18 = vrot.slane %v1846_v4, 4  ;;  %v1854_v27 = vrot.slane %v1853_v12, 4  ;;  %v1860_v49 = vsel %vm1149_vm1, %v1760_v34, 0.0 }
 0x202   : > { %v1821_v21 = vrot.slane %v1820_v42, 2  ;;  %v1828_v39 = vrot.slane %v1827_v50, 2  ;;  %v1841_v2 = vadd.f32 %v1840_v6, %v1839_v11  ;;  %v1861_v33 = vrot.slane %v1860_v49, 4 }
 0x203   : > { %v1835_v37 = vrot.slane %v1834_v57, 2  ;;  %v1848_v45 = vadd.f32 %v1847_v18, %v1846_v4  ;;  %v1855_v44 = vadd.f32 %v1854_v27, %v1853_v12  ;;  %v1867_v29 = vsel %vm1149_vm1, %v1761_v9, 0.0 }
 0x204   : > { %v1822_v13 = vadd.f32 %v1821_v21, %v1820_v42  ;;  %v1829_v3 = vadd.f32 %v1828_v39, %v1827_v50  ;;  %v1842_v22 = vrot.slane %v1841_v2, 2  ;;  %v1862_v52 = vadd.f32 %v1861_v33, %v1860_v49 }
 0x205   : > { %v1836_v47 = vadd.f32 %v1835_v37, %v1834_v57  ;;  %v1849_v16 = vrot.slane %v1848_v45, 2  ;;  %v1856_v25 = vrot.slane %v1855_v44, 2  ;;  %v1868_v40 = vrot.slane %v1867_v29, 4 }
 0x206   : > { %v1823_v58 = vrot.slane %v1822_v13, 1  ;;  %v1830_v36 = vrot.slane %v1829_v3, 1  ;;  %v1843_v34 = vadd.f32 %v1842_v22, %v1841_v2  ;;  %v1863_v63 = vrot.slane %v1862_v52, 2 }
 0x207   : > { %v1837_v1 = vrot.slane %v1836_v47, 1  ;;  %v1803_v0 = vadd.f32 %v1802_v60, %v1801_v41  ;;  %v1850_v11 = vadd.f32 %v1849_v16, %v1848_v45  ;;  %v1857_v6 = vadd.f32 %v1856_v25, %v1855_v44  ;;  %v4343_v45 = vld [vmem:[#allocation27_spill] sm:$0xff]  ;;  %v4349_v16 = vld [vmem:[#allocation26_spill] sm:$0xff] }
 0x208   : > { %v1869_v42 = vadd.f32 %v1868_v40, %v1867_v29  ;;  %v1810_v4 = vadd.f32 %v1809_v38, %v1808_v59  ;;  %v1817_v12 = vadd.f32 %v1816_v51, %v1815_v26  ;;  %v1844_v21 = vrot.slane %v1843_v34, 1  ;;  %v4340_v26 = vld [vmem:[#allocation22_spill] sm:$0xff]  ;;  %v4341_v51 = vld [vmem:[#allocation24_spill] sm:$0xff]  ;;  %v4344_v29 = vld [vmem:[#allocation23_spill] sm:$0xff] }
 0x209   : > { %v1864_v9 = vadd.f32 %v1863_v63, %v1862_v52  ;;  %v1824_v50 = vadd.f32 %v1823_v58, %v1822_v13  ;;  %v1851_v57 = vrot.slane %v1850_v11, 1  ;;  %v1858_v18 = vrot.slane %v1857_v6, 1  ;;  %v4348_v52 = vld [vmem:[#allocation32_spill] sm:$0xff] }
 0x20a   : > { %v1870_v27 = vrot.slane %v1869_v42, 2  ;;  %v1831_v49 = vadd.f32 %v1830_v36, %v1829_v3  ;;  %v1838_v39 = vadd.f32 %v1837_v1, %v1836_v47  ;;  %v1874_v33 = vadd.f32 %v1768_v10, %v3619_v56  ;;  %v4342_v56 = vld [vmem:[#allocation28_spill] sm:$0xff] }
 0x20b   : > { %v1865_v37 = vrot.slane %v1864_v9, 1  ;;  %v1845_v7 = vadd.f32 %v1844_v21, %v1843_v34  ;;  %v1852_v2 = vadd.f32 %v1851_v57, %v1850_v11  ;;  %v1875_v41 = vadd.f32 %v3904_v48, %v3641_v30  ;;  %v4345_v30 = vld [vmem:[#allocation25_spill] sm:$0xff]  ;;  %v4350_v11 = vld [vmem:[#allocation31_spill] sm:$0xff] }
 0x20c   : > { %v1871_v22 = vadd.f32 %v1870_v27, %v1869_v42  ;;  %v1859_v60 = vadd.f32 %v1858_v18, %v1857_v6  ;;  %v1876_v59 = vadd.f32 %v3906_v53, %v3661_v8  ;;  %v1877_v63 = vadd.f32 %v1789_v43, %v3657_v28  ;;  %v4346_v8 = vld [vmem:[#allocation29_spill] sm:$0xff]  ;;  %v4347_v43 = vld [vmem:[#allocation30_spill] sm:$0xff] }
 0x20d   : > { %v1878_v38 = vadd.f32 %v3908_v5, %v4340_v26  ;;  %v1866_v36 = vadd.f32 %v1865_v37, %v1864_v9  ;;  %v1879_v13 = vadd.f32 %v1803_v0, %v4341_v51  ;;  %v1880_v10 = vadd.f32 %v1810_v4, %v4342_v56  ;;  %v4351_v57 = vld [vmem:[#allocation33_spill] sm:$0xff] }
 0x20e   : > { %v1872_v1 = vrot.slane %v1871_v22, 1  ;;  %v1881_v44 = vadd.f32 %v1817_v12, %v4343_v45  ;;  %v3932_v3 = vadd.f32 %v1824_v50, %v4344_v29  ;;  %v3935_v48 = vadd.f32 %v1831_v49, %v4345_v30 }
 0x20f   : > { %v3938_v53 = vadd.f32 %v1838_v39, %v4346_v8  ;;  %v3941_v5 = vadd.f32 %v1852_v2, %v4347_v43  ;;  %v1890_v47 = vsel %vm1149_vm1, %v1874_v33, -inf  ;;  %v1891_v0 = vsel %vm1149_vm1, %v1875_v41, -inf }
 0x210   : > { %v1873_v28 = vadd.f32 %v1872_v1, %v1871_v22  ;;  %v3946_v58 = vadd.f32 %v1845_v7, %v4348_v52  ;;  %v3949_v25 = vadd.f32 %v1859_v60, %v4349_v16  ;;  %v1892_v40 = vmax.f32 %v1890_v47, %v1891_v0 }
 0x211   : > { %v1897_v34 = vsel %vm1149_vm1, %v1878_v38, -inf  ;;  %v3953_v6 = vadd.f32 %v1866_v36, %v4350_v11  ;;  %v1893_v42 = vsel %vm1149_vm1, %v1876_v59, -inf  ;;  %v1895_v4 = vsel %vm1149_vm1, %v1877_v63, -inf }
 0x212   : > { %v1898_v12 = vsel %vm1149_vm1, %v1879_v13, -inf  ;;  %v1894_v21 = vmax.f32 %v1892_v40, %v1893_v42  ;;  %v1904_v7 = vsel %vm1149_vm1, %v3932_v3, -inf  ;;  %v1905_v50 = vsel %vm1149_vm1, %v3935_v48, -inf }
 0x213   : > { %v1899_v9 = vmax.f32 %v1897_v34, %v1898_v12  ;;  %v3963_v18 = vadd.f32 %v1873_v28, %v4351_v57  ;;  %v1900_v27 = vsel %vm1149_vm1, %v1880_v10, -inf  ;;  %v1906_v49 = vmax.f32 %v1904_v7, %v1905_v50 }
 0x214   : > { %v1911_v39 = vsel %vm1149_vm1, %v3941_v5, -inf  ;;  %v1896_v37 = vmax.f32 %v1894_v21, %v1895_v4  ;;  %v1907_v22 = vsel %vm1149_vm1, %v3938_v53, -inf  ;;  %v1912_v60 = vsel %vm1149_vm1, %v3949_v25, -inf }
 0x215   : > { %v1901_v2 = vmax.f32 %v1899_v9, %v1900_v27  ;;  %v1902_v26 = vsel %vm1149_vm1, %v1881_v44, -inf  ;;  %v1908_v36 = vmax.f32 %v1906_v49, %v1907_v22  ;;  %v1913_v1 = vmax.f32 %v1911_v39, %v1912_v60 }
 0x216   : > { %v1914_v51 = vsel %vm1149_vm1, %v3953_v6, -inf  ;;  %v1918_v45 = vsub.f32 %v1874_v33, %v1896_v37  ;;  %v1919_v29 = vsub.f32 %v1875_v41, %v1896_v37  ;;  %v1920_v30 = vsub.f32 %v1876_v59, %v1896_v37 }
 0x217   : > { %v1903_v56 = vmax.f32 %v1901_v2, %v1902_v26  ;;  %v1909_v8 = vsel %vm1149_vm1, %v3946_v58, -inf  ;;  %v1915_v28 = vmax.f32 %v1913_v1, %v1914_v51  ;;  %v1921_v47 = vsub.f32 %v1877_v63, %v1896_v37 }
 0x218   : > { %v1910_v43 = vmax.f32 %v1908_v36, %v1909_v8  ;;  %v1916_v52 = vsel %vm1149_vm1, %v3963_v18, -inf  ;;  %v1934_v34 = vmul.f32 1.442695, %v1918_v45  ;;  %v1936_v11 = vmul.f32 1.442695, %v1919_v29 }
 0x219   : > { %v1922_v0 = vsub.f32 %v1878_v38, %v1903_v56  ;;  %v1923_v16 = vsub.f32 %v1879_v13, %v1903_v56  ;;  %v1924_v40 = vsub.f32 %v1880_v10, %v1903_v56  ;;  %v1938_v42 = vmul.f32 1.442695, %v1920_v30 }
 0x21a   : > { %v1917_v4 = vmax.f32 %v1915_v28, %v1916_v52  ;;  %v1925_v12 = vsub.f32 %v1881_v44, %v1903_v56  ;;  %v1926_v33 = vsub.f32 %v3932_v3, %v1910_v43  ;;  %2624 = vpow2.f32 %v1934_v34 }
 0x21b   : > { %v1940_v41 = vmul.f32 1.442695, %v1921_v47  ;;  %v1942_v59 = vmul.f32 1.442695, %v1922_v0  ;;  %v1927_v21 = vsub.f32 %v3935_v48, %v1910_v43  ;;  %2626 = vpow2.f32 %v1936_v11 }
 0x21c   : > { %v1944_v63 = vmul.f32 1.442695, %v1923_v16  ;;  %v1928_v38 = vsub.f32 %v3938_v53, %v1910_v43  ;;  %2628 = vpow2.f32 %v1938_v42  ;;  %v1946_v9 = vmul.f32 1.442695, %v1924_v40 }
 0x21d   : > { %v1929_v13 = vsub.f32 %v3946_v58, %v1910_v43  ;;  %2630 = vpow2.f32 %v1940_v41  ;;  %v1948_v10 = vmul.f32 1.442695, %v1925_v12  ;;  %v1930_v7 = vsub.f32 %v3941_v5, %v1917_v4 }
 0x21e   : > { %2632 = vpow2.f32 %v1942_v59  ;;  %v1950_v44 = vmul.f32 1.442695, %v1926_v33  ;;  %v1931_v3 = vsub.f32 %v3949_v25, %v1917_v4  ;;  %v1952_v50 = vmul.f32 1.442695, %v1927_v21 }
 0x21f   : > { %2634 = vpow2.f32 %v1944_v63  ;;  %v1932_v48 = vsub.f32 %v3953_v6, %v1917_v4  ;;  %v1954_v57 = vmul.f32 1.442695, %v1928_v38  ;;  %v1933_v53 = vsub.f32 %v3963_v18, %v1917_v4 }
 0x220   : > { %2636 = vpow2.f32 %v1946_v9  ;;  %v1956_v27 = vmul.f32 1.442695, %v1929_v13  ;;  %v1958_v58 = vmul.f32 1.442695, %v1930_v7  ;;  %v1960_v49 = vmul.f32 1.442695, %v1931_v3 }
 0x221   : > { %2638 = vpow2.f32 %v1948_v10  ;;  %v1962_v5 = vmul.f32 1.442695, %v1932_v48  ;;  %v1964_v25 = vmul.f32 1.442695, %v1933_v53 }
 0x222   : > { %2640 = vpow2.f32 %v1950_v44 }
 0x223   : > { %2642 = vpow2.f32 %v1952_v50 }
 0x224   : > { %v3987_v39 = vpop.eup %2624  ;;  %2644 = vpow2.f32 %v1954_v57 }
 0x225   : > { %v3989_v37 = vpop.eup %2626  ;;  %2646 = vpow2.f32 %v1956_v27 }
 0x226   : > { %v3991_v2 = vpop.eup %2628  ;;  %2648 = vpow2.f32 %v1958_v58  ;;  %v1982_v6 = vrot.slane %v3989_v37, 7 }
 0x227   : > { %v3994_v18 = vpop.eup %2630  ;;  %2650 = vpow2.f32 %v1960_v49  ;;  %v1984_v22 = vrot.slane %v3991_v2, 6 }
 0x228   : > { %v3997_v60 = vpop.eup %2632  ;;  %2652 = vpow2.f32 %v1962_v5  ;;  %v1983_v26 = vsel %vm1479_vm2, %v1982_v6, %v3987_v39  ;;  %v1986_v36 = vrot.slane %v3994_v18, 5 }
 0x229   : > { %v4002_v1 = vpop.eup %2634  ;;  %2654 = vpow2.f32 %v1964_v25  ;;  %v1985_v51 = vsel %vm1482_vm3, %v1984_v22, %v1983_v26 }
 0x22a   : > { %v4005_v56 = vpop.eup %2636  ;;  %v1987_v45 = vsel %vm1485_vm4, %v1986_v36, %v1985_v51  ;;  %v1988_v29 = vrot.slane %v4002_v1, 7 }
 0x22b   : > { %v4009_v30 = vpop.eup %2638  ;;  %v1990_v8 = vrot.slane %v4005_v56, 6  ;;  %v2010_v28 = vsel %vm1509_vm5, %v1987_v45, 0.0 }
 0x22c   : > { %v4013_v43 = vpop.eup %2640  ;;  %v1989_v47 = vsel %vm1479_vm2, %v1988_v29, %v3997_v60  ;;  %v1992_v0 = vrot.slane %v4009_v30, 5  ;;  %v2011_v52 = vrot.slane %v2010_v28, 4 }
 0x22d   : > { %v4018_v16 = vpop.eup %2642  ;;  %v1991_v40 = vsel %vm1482_vm3, %v1990_v8, %v1989_v47 }
 0x22e   : > { %v4021_v34 = vpop.eup %2644  ;;  %v1993_v11 = vsel %vm1485_vm4, %v1992_v0, %v1991_v40  ;;  %v1994_v42 = vrot.slane %v4018_v16, 7  ;;  %v2012_v4 = vadd.f32 %v2011_v52, %v2010_v28 }
 0x22f   : > { %v4025_v12 = vpop.eup %2646  ;;  %v1996_v33 = vrot.slane %v4021_v34, 6  ;;  %v2017_v41 = vsel %vm1509_vm5, %v1993_v11, 0.0 }
 0x230   : > { %v4029_v59 = vpop.eup %2648  ;;  %v1995_v21 = vsel %vm1479_vm2, %v1994_v42, %v4013_v43  ;;  %v1998_v63 = vrot.slane %v4025_v12, 5  ;;  %v2013_v38 = vrot.slane %v2012_v4, 2  ;;  %v2018_v9 = vrot.slane %v2017_v41, 4 }
 0x231   : > { %v4034_v13 = vpop.eup %2650  ;;  %v1997_v10 = vsel %vm1482_vm3, %v1996_v33, %v1995_v21 }
 0x232   : > { %v4037_v7 = vpop.eup %2652  ;;  %v1999_v44 = vsel %vm1485_vm4, %v1998_v63, %v1997_v10  ;;  %v2000_v3 = vrot.slane %v4034_v13, 7  ;;  %v2014_v50 = vadd.f32 %v2013_v38, %v2012_v4  ;;  %v2019_v48 = vadd.f32 %v2018_v9, %v2017_v41 }
 0x233   : > { %v4041_v57 = vpop.eup %2654  ;;  %v2002_v53 = vrot.slane %v4037_v7, 6  ;;  %v2024_v27 = vsel %vm1509_vm5, %v1999_v44, 0.0 }
 0x234   : > { %v2001_v58 = vsel %vm1479_vm2, %v2000_v3, %v4029_v59  ;;  %v2004_v49 = vrot.slane %v4041_v57, 5  ;;  %v2015_v5 = vrot.slane %v2014_v50, 1  ;;  %v2020_v25 = vrot.slane %v2019_v48, 2 }
 0x235   : > { %v2003_v6 = vsel %vm1482_vm3, %v2002_v53, %v2001_v58  ;;  %v2025_v22 = vrot.slane %v2024_v27, 4 }
 0x236   : > { %v2005_v26 = vsel %vm1485_vm4, %v2004_v49, %v2003_v6  ;;  %v2016_v36 = vadd.f32 %v2015_v5, %v2014_v50  ;;  %v2021_v51 = vadd.f32 %v2020_v25, %v2019_v48 }
 0x237   : > { %v2026_v45 = vadd.f32 %v2025_v22, %v2024_v27  ;;  %v2031_v29 = vsel %vm1509_vm5, %v2005_v26, 0.0 }
 0x238   : > { %v2022_v8 = vrot.slane %v2021_v51, 1  ;;  %v2032_v28 = vrot.slane %v2031_v29, 4  ;;  %2656 = vrcp.f32 %v2016_v36 }
 0x239   : > { %v2027_v47 = vrot.slane %v2026_v45, 2 }
 0x23a   : > { %v2023_v0 = vadd.f32 %v2022_v8, %v2021_v51  ;;  %v2033_v52 = vadd.f32 %v2032_v28, %v2031_v29 }
 0x23b   : > { %v2028_v40 = vadd.f32 %v2027_v47, %v2026_v45 }
 0x23c   : > { %v2034_v11 = vrot.slane %v2033_v52, 2  ;;  %2658 = vrcp.f32 %v2023_v0 }
 0x23d   : > { %v2029_v42 = vrot.slane %v2028_v40, 1 }
 0x23e   : > { %v2035_v4 = vadd.f32 %v2034_v11, %v2033_v52 }
 0x23f   : > { %v2030_v33 = vadd.f32 %v2029_v42, %v2028_v40 }
 0x240   : > { %v2036_v41 = vrot.slane %v2035_v4, 1 }
 0x241   : > { %2660 = vrcp.f32 %v2030_v33 }
 0x242   : > { %v2657_v21 = vpop.eup %2656  ;;  %v2037_v63 = vadd.f32 %v2036_v41, %v2035_v4 }
 0x243   : > { %v2045_v38 = vrot.slane %v2657_v21, %v4339_v24 }
 0x244   : > { %2662 = vrcp.f32 %v2037_v63 }
 0x245   : > { %v2058_v9 = vmul.f32 %v3987_v39, %v2045_v38  ;;  %v2059_v10 = vmul.f32 %v3989_v37, %v2045_v38  ;;  %v2060_v44 = vmul.f32 %v3991_v2, %v2045_v38  ;;  %v2061_v3 = vmul.f32 %v3994_v18, %v2045_v38 }
 0x246   : > { %v2659_v50 = vpop.eup %2658 }
 0x247   : > { %v2049_v48 = vrot.slane %v2659_v50, %v4339_v24  ;;  %v2077_v53 = vrot.slane %v2058_v9, %v4339_v24  ;;  %v2081_v27 = vrot.slane %v2059_v10, %v4339_v24  ;;  %v2085_v58 = vrot.slane %v2060_v44, %v4339_v24  ;;  %v4352_v10 = vld [vmem:[#allocation17_spill] sm:$0xff]  ;;  %v4353_v50 = vld [vmem:[#allocation16_spill] sm:$0xff] }
 0x248   : > { %v2089_v49 = vrot.slane %v2061_v3, %v4339_v24 }
 0x249   : > { %v2062_v5 = vmul.f32 %v3997_v60, %v2049_v48  ;;  %v2063_v39 = vmul.f32 %v4002_v1, %v2049_v48  ;;  %v2064_v37 = vmul.f32 %v4005_v56, %v2049_v48  ;;  %v2065_v2 = vmul.f32 %v4009_v30, %v2049_v48 }
 0x24a   : > { %v2138_v18 = vmul.f32 %v2077_v53, %v3466_v46  ;;  %v2139_v25 = vmul.f32 %v2081_v27, %v3482_v14  ;;  %v2140_v6 = vmul.f32 %v2085_v58, %v3506_v31  ;;  %v2141_v56 = vmul.f32 %v2089_v49, %v3498_v55 }
 0x24b   : > { %v2661_v22 = vpop.eup %2660  ;;  %v2093_v26 = vrot.slane %v2062_v5, %v4339_v24  ;;  %v2097_v36 = vrot.slane %v2063_v39, %v4339_v24  ;;  %v2101_v51 = vrot.slane %v2064_v37, %v4339_v24  ;;  %v2105_v60 = vrot.slane %v2065_v2, %v4339_v24 }
 0x24c   : > { %v2053_v1 = vrot.slane %v2661_v22, %v4339_v24  ;;  %v2154_v30 = vsel %vm1149_vm1, %v2138_v18, 0.0  ;;  %v2161_v46 = vsel %vm1149_vm1, %v2139_v25, 0.0  ;;  %v2168_v29 = vsel %vm1149_vm1, %v2140_v6, 0.0  ;;  %v4354_v22 = vld [vmem:[#allocation19_spill] sm:$0xff] }
 0x24d   : > { %v2142_v14 = vmul.f32 %v2093_v26, %v3468_v19  ;;  %v2143_v31 = vmul.f32 %v2097_v36, %v3484_v15  ;;  %v2144_v45 = vmul.f32 %v2101_v51, %v3508_v23  ;;  %v2145_v40 = vmul.f32 %v2105_v60, %v3500_v62  ;;  %v4355_v36 = vld [vmem:[#allocation18_spill] sm:$0xff] }
 0x24e   : > { %v2663_v8 = vpop.eup %2662  ;;  %v2066_v28 = vmul.f32 %v4013_v43, %v2053_v1  ;;  %v2067_v47 = vmul.f32 %v4018_v16, %v2053_v1  ;;  %v2068_v0 = vmul.f32 %v4021_v34, %v2053_v1  ;;  %v2069_v55 = vmul.f32 %v4025_v12, %v2053_v1 }
 0x24f   : > { %v2057_v52 = vrot.slane %v2663_v8, %v4339_v24  ;;  %v2155_v19 = vsel %vm1149_vm1, %v2142_v14, 0.0  ;;  %v2162_v15 = vsel %vm1149_vm1, %v2143_v31, 0.0  ;;  %v2169_v21 = vsel %vm1149_vm1, %v2144_v45, 0.0 }
 0x250   : > { %v2109_v23 = vrot.slane %v2066_v28, %v4339_v24  ;;  %v2113_v11 = vrot.slane %v2067_v47, %v4339_v24  ;;  %v2117_v43 = vrot.slane %v2068_v0, %v4339_v24  ;;  %v2121_v16 = vrot.slane %v2069_v55, %v4339_v24  ;;  %v4357_v28 = vld [vmem:[#allocation20_spill] sm:$0xff] }
 0x251   : > { %v2070_v34 = vmul.f32 %v4029_v59, %v2057_v52  ;;  %v2071_v12 = vmul.f32 %v4034_v13, %v2057_v52  ;;  %v2072_v42 = vmul.f32 %v4037_v7, %v2057_v52  ;;  %v2073_v62 = vmul.f32 %v4041_v57, %v2057_v52 }
 0x252   : > { %v2146_v4 = vmul.f32 %v2109_v23, %v3470_v17  ;;  %v2147_v33 = vmul.f32 %v2113_v11, %v3486_v32  ;;  %v2148_v41 = vmul.f32 %v2117_v43, %v3510_v35  ;;  %v2149_v7 = vmul.f32 %v2121_v16, %v3502_v61 }
 0x253   : > { %v2125_v63 = vrot.slane %v2070_v34, %v4339_v24  ;;  %v2129_v38 = vrot.slane %v2071_v12, %v4339_v24  ;;  %v2133_v59 = vrot.slane %v2072_v42, %v4339_v24  ;;  %v2137_v13 = vrot.slane %v2073_v62, %v4339_v24 }
 0x254   : > { %v2156_v9 = vadd.f32 %v2155_v19, %v2154_v30  ;;  %v2157_v57 = vsel %vm1149_vm1, %v2146_v4, 0.0  ;;  %v2163_v17 = vadd.f32 %v2162_v15, %v2161_v46  ;;  %v2164_v3 = vsel %vm1149_vm1, %v2147_v33, 0.0 }
 0x255   : > { %v2150_v32 = vmul.f32 %v2125_v63, %v3472_v20  ;;  %v2151_v35 = vmul.f32 %v2129_v38, %v3496_v54  ;;  %v2152_v44 = vmul.f32 %v2133_v59, %v4352_v10  ;;  %v2153_v48 = vmul.f32 %v2137_v13, %v4353_v50 }
 0x256   : > { %v2158_v53 = vadd.f32 %v2157_v57, %v2156_v9  ;;  %v2165_v27 = vadd.f32 %v2164_v3, %v2163_v17  ;;  %v2170_v58 = vadd.f32 %v2169_v21, %v2168_v29  ;;  %v2171_v49 = vsel %vm1149_vm1, %v2148_v41, 0.0 }
 0x257   : > { %v2159_v24 = vsel %vm1149_vm1, %v2150_v32, 0.0  ;;  %v2166_v61 = vsel %vm1149_vm1, %v2151_v35, 0.0  ;;  %v2175_v5 = vsel %vm1149_vm1, %v2141_v56, 0.0  ;;  %v2176_v37 = vsel %vm1149_vm1, %v2145_v40, 0.0  ;;  %v4356_v56 = vld [vmem:[#allocation21_spill] sm:$0xff] }
 0x258   : > { %v2160_v20 = vadd.f32 %v2159_v24, %v2158_v53  ;;  %v2167_v39 = vadd.f32 %v2166_v61, %v2165_v27  ;;  %v2172_v54 = vadd.f32 %v2171_v49, %v2170_v58  ;;  %v2173_v2 = vsel %vm1149_vm1, %v2152_v44, 0.0 }
 0x259   : > { %v2177_v18 = vadd.f32 %v2176_v37, %v2175_v5  ;;  %v2178_v6 = vsel %vm1149_vm1, %v2149_v7, 0.0  ;;  %v2180_v1 = vsel %vm1149_vm1, %v2153_v48, 0.0 }
 0x25a   : > { %v2174_v25 = vadd.f32 %v2173_v2, %v2172_v54  ;;  %v4119_v26 = vadd.f32 %v2160_v20, %v4354_v22  ;;  %v4122_v51 = vadd.f32 %v2167_v39, %v4355_v36 }
 0x25b   : > { %v2179_v60 = vadd.f32 %v2178_v6, %v2177_v18 }
 0x25c   : > { %v4126_v30 = vadd.f32 %v2174_v25, %v4356_v56  ;;  %v2186_v46 = vmul.f32 %v4119_v26, %v4119_v26  ;;  %v2187_v14 = vmul.f32 %v4122_v51, %v4122_v51 }
 0x25d   : > { %v2181_v31 = vadd.f32 %v2180_v1, %v2179_v60 }
 0x25e   : > { %v2188_v45 = vmul.f32 %v4126_v30, %v4126_v30  ;;  %v2190_v29 = vsel %vm1149_vm1, %v2186_v46, 0.0  ;;  %v2197_v8 = vsel %vm1149_vm1, %v2187_v14, 0.0 }
 0x25f   : > { %v4137_v47 = vadd.f32 %v2181_v31, %v4357_v28  ;;  %v2191_v0 = vrot.slane %v2190_v29, 4  ;;  %v2198_v55 = vrot.slane %v2197_v8, 4 }
 0x260   : > { %v2204_v52 = vsel %vm1149_vm1, %v2188_v45, 0.0 }
 0x261   : > { %v2189_v40 = vmul.f32 %v4137_v47, %v4137_v47  ;;  %v2192_v19 = vadd.f32 %v2191_v0, %v2190_v29  ;;  %v2199_v15 = vadd.f32 %v2198_v55, %v2197_v8  ;;  %v2205_v23 = vrot.slane %v2204_v52, 4 }
 0x263   : > { %v2193_v11 = vrot.slane %v2192_v19, 2  ;;  %v2200_v43 = vrot.slane %v2199_v15, 2  ;;  %v2206_v16 = vadd.f32 %v2205_v23, %v2204_v52  ;;  %v2211_v34 = vsel %vm1149_vm1, %v2189_v40, 0.0 }
 0x264   : > { %v2212_v12 = vrot.slane %v2211_v34, 4 }
 0x265   : > { %v2194_v42 = vadd.f32 %v2193_v11, %v2192_v19  ;;  %v2201_v62 = vadd.f32 %v2200_v43, %v2199_v15  ;;  %v2207_v4 = vrot.slane %v2206_v16, 2 }
 0x266   : > { %v2213_v33 = vadd.f32 %v2212_v12, %v2211_v34 }
 0x267   : > { %v2195_v41 = vrot.slane %v2194_v42, 1  ;;  %v2202_v21 = vrot.slane %v2201_v62, 1  ;;  %v2208_v63 = vadd.f32 %v2207_v4, %v2206_v16 }
 0x268   : > { %v2214_v38 = vrot.slane %v2213_v33, 2 }
 0x269   : > { %v2196_v59 = vadd.f32 %v2195_v41, %v2194_v42  ;;  %v2203_v13 = vadd.f32 %v2202_v21, %v2201_v62  ;;  %v2209_v7 = vrot.slane %v2208_v63, 1 }
 0x26a   : > { %v2215_v9 = vadd.f32 %v2214_v38, %v2213_v33 }
 0x26b   : > { %v2210_v57 = vadd.f32 %v2209_v7, %v2208_v63  ;;  %v2218_v17 = vadd.f32 1e-12, %v2196_v59  ;;  %v2219_v32 = vadd.f32 1e-12, %v2203_v13  ;;  %v2230_v10 = vadd.f32 1.0, %v2196_v59 }
 0x26c   : > { %v2216_v35 = vrot.slane %v2215_v9, 1  ;;  %v2231_v3 = vadd.f32 1.0, %v2203_v13 }
 0x26d   : > { %v2220_v44 = vadd.f32 1e-12, %v2210_v57  ;;  %2664 = vrsqrt.f32 %v2218_v17  ;;  %v2232_v48 = vadd.f32 1.0, %v2210_v57 }
 0x26e   : > { %v2217_v50 = vadd.f32 %v2216_v35, %v2215_v9  ;;  %2666 = vrsqrt.f32 %v2219_v32 }
 0x26f   : > { %2668 = vrsqrt.f32 %v2220_v44 }
 0x270   : > { %v2221_v53 = vadd.f32 1e-12, %v2217_v50  ;;  %v2233_v27 = vadd.f32 1.0, %v2217_v50  ;;  %2670 = vrcp.f32 %v2230_v10 }
 0x271   : > { %2672 = vrcp.f32 %v2231_v3 }
 0x272   : > { %2674 = vrsqrt.f32 %v2221_v53 }
 0x273   : > { %2676 = vrcp.f32 %v2232_v48 }
 0x274   : > { %2678 = vrcp.f32 %v2233_v27 }
 0x277   : > { %v2665_v58 = vpop.eup %2664 }
 0x278   : > { %v2667_v24 = vpop.eup %2666  ;;  %v2226_v61 = vmul.f32 %v2665_v58, %v2196_v59 }
 0x279   : > { %v2669_v49 = vpop.eup %2668  ;;  %v2227_v5 = vmul.f32 %v2667_v24, %v2203_v13 }
 0x27a   : > { %v2671_v20 = vpop.eup %2670  ;;  %v2228_v39 = vmul.f32 %v2669_v49, %v2210_v57 }
 0x27b   : > { %v2673_v54 = vpop.eup %2672  ;;  %v2238_v37 = vmul.f32 %v2671_v20, %v2226_v61 }
 0x27c   : > { %v2675_v2 = vpop.eup %2674  ;;  %v2239_v18 = vmul.f32 %v2673_v54, %v2227_v5 }
 0x27d   : > { %v2677_v25 = vpop.eup %2676  ;;  %v2229_v6 = vmul.f32 %v2675_v2, %v2217_v50  ;;  %v2242_v22 = vmul.f32 %v2238_v37, %v4119_v26 }
 0x27e   : > { %v2679_v36 = vpop.eup %2678  ;;  %v2240_v60 = vmul.f32 %v2677_v25, %v2228_v39  ;;  %v2243_v1 = vmul.f32 %v2239_v18, %v4122_v51 }
 0x27f   : > { %v2241_v56 = vmul.f32 %v2679_v36, %v2229_v6  ;;  %2246 = vst.msk [vmem:[%s254_s26] sm:$0xff] %vm1149_vm1, %v2242_v22 }
 0x280   : > { %v2244_v46 = vmul.f32 %v2240_v60, %v4126_v30  ;;  %2247 = vst.msk [vmem:[%s254_s26 + $0x8] sm:$0xff] %vm1149_vm1, %v2243_v1 }
 0x281   : > { %v2245_v26 = vmul.f32 %v2241_v56, %v4137_v47 }
 0x282   : > { %2248 = vst.msk [vmem:[%s254_s26 + $0x10] sm:$0xff] %vm1149_vm1, %v2244_v46 }
 0x283   : > { %2249 = vst.msk [vmem:[%s254_s26 + $0x18] sm:$0xff] %vm1149_vm1, %v2245_v26 }
 0x284   : > { %2753 = shalt.err (!%p2750_p8)
}
 0x285   : > { %s2754_s15 = scalar_lea.hbm %s4159_s23, 512  ;;  %s2758_s26 = scalar_lea.hbm %s4359_s9, 4096 }
 0x286   : > { %p2755_p0 = scmp.ne.s32.totalorder %s4159_s23, %s2754_s15  ;;  %p2759_p7 = scmp.lt.u32.totalorder %s4159_s23, %s4359_s9 }
 0x287   : > { %p2760_p10 = scmp.lt.u32.totalorder %s2758_s26, %s2754_s15  ;;  %p2762_p13 = scmp.lt.u32.totalorder %s2754_s15, %s4159_s23 }
 0x288   : > { %p2756_p1 = pnand %p2755_p0, %p4360_p6 }
 0x289   : > { %p2761_p9 = por %p2760_p10, %p2759_p7 }
 0x28a   : > { %p2757_p5 = pneg %p2756_p1 }
 0x28b   : > { %p2763_p4 = por %p2762_p13, %p2761_p9 }
 0x28d   : > { %p2764_p12 = pnand %p2763_p4, %p2757_p5 }
 0x28f   : > { %2767 = shalt.err (!%p2764_p12)
}
 0x290   : > { %s2899_s10 = smov 128   ;;  %s2900_s18 = smov 8  }
 0x291   : > { %2417 = dma.vmem_to_hbm [thread:$0]  (%p4360_p6), %s4153_s3, 512, %s4159_s23, %s4165_s8, %s2899_s10, %s2899_s10, %s2900_s18  }
 0x292 PF: > { %p2431_p3 = scmp.ge.s32.totalorder %s2890_s25, 2  ;;  %s2282_s30 = sand.u32 1, %s2838_s12  }
 0x293   : > { %p4361_p2 = scmp.ne.s32.totalorder %s4300_s28, 0  ;;  %s2283_s4 = scalar_lea.sflag [#allocation4], %s2282_s30 }
 0x295   : > { %p2427_p11 = pnand %p2431_p3, %p4361_p2 }
 0x297   : > { %2833 = dma.done.wait (!%p2427_p11), %s2283_s4, 512  }
 0x298   : > { %2835 = vsyncadd (!%p2427_p11), %s2283_s4, 4294966784  ;;  %s22_s25 = sadd.s32 1, %s2890_s25   ;;  %s4363_s21 = sld [smem:[#allocation11_spill]] }
 0x299   : > { %p4194_p8 = scmp.ge.s32.totalorder %s22_s25, 10   ;;  %s4364_s22 = sld [smem:[#allocation12_spill]] }
 0x29a   : > { %s4365_s23 = sld [smem:[#allocation13_spill]]  ;;  %s4366_s24 = sld [smem:[#allocation14_spill]] }
 0x29b   : > { %s4367_s12 = smov %s2842_s13  ;;  %s4368_s13 = smov %s2846_s14 }
 0x29c   : > { %s4369_s14 = smov %s3113_s5  ;;  %s4370_s15 = smov %s2854_s16 }
 0x29d   : > { %s4371_s16 = smov %s2858_s17  ;;  %s4372_s17 = smov %s3095_s6 }
 0x29e   : > { %s4373_s18 = smov %s2866_s19  ;;  %s4374_s19 = smov %s2870_s20 }
 0x29f   : > { %s4375_s20 = smov %s3110_s0  ;;  %21 = sbr.rel (!%p4194_p8) target bundleno = 15 (0xf), region = 90 }
 0x2a6   :  { %2288 = vsyncpa [#allocation3], 1 }
 0x2a7   :  { %2290 = vsyncpa [#allocation3 + $0x1], 1 }
 0x2a8   :  { %2291 = vsyncpa [#allocation6], 1 }
 0x2a9   :  { %2293 = vsyncpa [#allocation6 + $0x1], 1 }
 0x2aa   :  { %2294 = vsyncpa [#allocation4], 1 }
 0x2ab   :  { %2296 = vsyncpa [#allocation4 + $0x1], 1 }

</bundles_post_ra>
